<compile_context>
chip_gen: v7x
topology: tpu7x:2x2x1
jax: 0.10.0
libtpu: 0.0.40
codegen_flags: <defaults>
</compile_context>

<pallas_src>
import functools

import jax
import jax.numpy as jnp
from jax.experimental import pallas as pl
from jax.experimental.pallas import tpu as pltpu


def _round_up(x, m):
    return (x + m - 1) // m * m


def _gemma_mlp_kernel(x_ref, wgu_ref, wd_ref, o_ref, acc_ref, *, ti):
    j = pl.program_id(1)

    @pl.when(j == 0)
    def _():
        acc_ref[...] = jnp.zeros_like(acc_ref)

    # Native-dtype operands straight to the MXU; f32 accumulation.
    # wgu_ref is the fused [W_gate_tile | W_up_tile] slab of shape (H, 2*ti).
    gu = jnp.dot(x_ref[...], wgu_ref[...], preferred_element_type=jnp.float32)
    gate = gu[:, :ti]
    up = gu[:, ti:]

    # tanh-approx GELU (matches torch.nn.functional.gelu(approximate='tanh')),
    # computed on the f32 accumulator output.
    c = jnp.float32(0.7978845608028654)  # sqrt(2/pi)
    g = 0.5 * gate * (1.0 + jnp.tanh(c * (gate + 0.044715 * gate * gate * gate)))

    # Cast the gated hidden back to the weight dtype so the down projection also
    # runs at native (e.g. bf16) MXU rate; accumulate the partial in f32.
    h = (g * up).astype(wd_ref.dtype)
    acc_ref[...] += jnp.dot(h, wd_ref[...], preferred_element_type=jnp.float32)

    @pl.when(j == pl.num_programs(1) - 1)
    def _():
        o_ref[...] = acc_ref[...].astype(o_ref.dtype)


def gemma_mlp(x, w_gate, w_up, w_down, *, tm=256, ti=512, vmem_limit_bytes=48 << 20):
    """GemmaMLP forward.

    x: [B, S, H]; w_gate / w_up: [H, I]; w_down: [I, H]  ->  [B, S, H]
    """
    B, S, H = x.shape
    I = w_gate.shape[1]
    M = B * S

    # ---- tile selection -------------------------------------------------
    # Don't over-pad tiny token counts, but keep tm MXU/lane friendly (mult of 128).
    tm = min(tm, _round_up(M, 128))
    # ti must evenly tile I and stay 128-lane aligned (v7x's 64 MiB VMEM budget is
    # respected with the default tm=256 / ti=512 even at real Gemma sizes).
    if I % 128 == 0:
        ti = min(ti, I)
        while I % ti != 0:
            ti -= 128
    else:
        ti = I  # odd intermediate size: fall back to a single full-I tile
    nI = I // ti

    # ---- pack [W_gate | W_up] per I-tile so each grid step loads ONE RHS slab.
    # (In a real model this repack happens once at weight-load time, not per call.)
    w_gu = jnp.concatenate(
        [w_gate.reshape(H, nI, ti), w_up.reshape(H, nI, ti)], axis=-1
    ).reshape(H, 2 * I)

    # ---- pad ragged token counts to a multiple of the M tile --------------
    Mp = _round_up(M, tm)
    x2d = x.reshape(M, H)
    if Mp != M:
        x2d = jnp.pad(x2d, ((0, Mp - M), (0, 0)))

    out2d = pl.pallas_call(
        functools.partial(_gemma_mlp_kernel, ti=ti),
        out_shape=jax.ShapeDtypeStruct((Mp, H), x.dtype),
        grid_spec=pltpu.PrefetchScalarGridSpec(
            num_scalar_prefetch=0,
            grid=(Mp // tm, nI),  # reduction (I) axis last
            in_specs=[
                pl.BlockSpec((tm, H), lambda i, j: (i, 0)),      # x tile
                pl.BlockSpec((H, 2 * ti), lambda i, j: (0, j)),  # fused [Wg|Wu] I-slice
                pl.BlockSpec((ti, H), lambda i, j: (j, 0)),      # Wd I-slice
            ],
            out_specs=pl.BlockSpec((tm, H), lambda i, j: (i, 0)),
            scratch_shapes=[pltpu.VMEM((tm, H), jnp.float32)],   # f32 down-proj acc
        ),
        compiler_params=pltpu.CompilerParams(
            dimension_semantics=("parallel", "arbitrary"),
            vmem_limit_bytes=vmem_limit_bytes,
        ),
    )(x2d, w_gu, w_down)

    return out2d[:M].reshape(B, S, H)


def _reference(x, w_gate, w_up, w_down):
    """Pure-JAX reference matching the PyTorch module (f32 math)."""
    xf = x.astype(jnp.float32)
    gate = xf @ w_gate.astype(jnp.float32)
    up = xf @ w_up.astype(jnp.float32)
    c = 0.7978845608028654
    g = 0.5 * gate * (1.0 + jnp.tanh(c * (gate + 0.044715 * gate ** 3)))
    return (g * up) @ w_down.astype(jnp.float32)


if __name__ == "__main__":
    key = jax.random.PRNGKey(0)

    # --- case 1: f32, ragged token count (exercises M padding) -------------
    B, S, H, I = 2, 9, 128, 512
    k1, k2, k3, k4, key = jax.random.split(key, 5)
    x = jax.random.normal(k1, (B, S, H), dtype=jnp.float32)
    wg = jax.random.normal(k2, (H, I), dtype=jnp.float32) * 0.05
    wu = jax.random.normal(k3, (H, I), dtype=jnp.float32) * 0.05
    wd = jax.random.normal(k4, (I, H), dtype=jnp.float32) * 0.05
    out = jax.block_until_ready(gemma_mlp(x, wg, wu, wd))
    ref = _reference(x, wg, wu, wd)
    assert out.shape == (B, S, H)
    assert jnp.allclose(out, ref, atol=1e-3, rtol=1e-3), "f32 mismatch vs reference"

    # --- case 2: bf16, multiple M tiles and I tiles (accumulation path) ----
    B, S, H, I = 4, 96, 256, 1024
    k1, k2, k3, k4, key = jax.random.split(key, 5)
    x = jax.random.normal(k1, (B, S, H), dtype=jnp.bfloat16)
    wg = (jax.random.normal(k2, (H, I), jnp.float32) * 0.05).astype(jnp.bfloat16)
    wu = (jax.random.normal(k3, (H, I), jnp.float32) * 0.05).astype(jnp.bfloat16)
    wd = (jax.random.normal(k4, (I, H), jnp.float32) * 0.05).astype(jnp.bfloat16)
    out = jax.block_until_ready(gemma_mlp(x, wg, wu, wd))
    ref = _reference(x, wg, wu, wd)
    assert out.shape == (B, S, H)
    rel = jnp.linalg.norm(out.astype(jnp.float32) - ref) / jnp.linalg.norm(ref)
    assert rel < 3e-2, f"bf16 mismatch vs reference (rel err {rel})"

    print("KERNEL_OK")
</pallas_src>

<mosaic_0001>
module attributes {stable_mosaic.version = 11 : i64} {
  func.func @_gemma_mlp_kernel(%arg0: i32, %arg1: i32, %arg2: memref<128x128xf32, #tpu.memory_space<vmem>>, %arg3: memref<128x1024xf32, #tpu.memory_space<vmem>>, %arg4: memref<512x128xf32, #tpu.memory_space<vmem>>, %arg5: memref<128x128xf32, #tpu.memory_space<vmem>>, %arg6: memref<128x128xf32, #tpu.memory_space<vmem>>) attributes {dimension_semantics = [#tpu.dimension_semantics<parallel>, #tpu.dimension_semantics<arbitrary>], iteration_bounds = array<i64: 1, 1>, scalar_prefetch = 0 : i64, scratch_operands = 1 : i64, tpu.core_type = #tpu.core_type<tc>, window_params = [{transform_indices = @transform_0, window_bounds = array<i64: 128, 128>}, {transform_indices = @transform_1, window_bounds = array<i64: 128, 1024>}, {transform_indices = @transform_2, window_bounds = array<i64: 512, 128>}, {transform_indices = @transform_3, window_bounds = array<i64: 128, 128>}]} {
    %c0_i32 = arith.constant 0 : i32
    %0 = arith.cmpi eq, %arg1, %c0_i32 : i32
    %1 = arith.extui %0 : i1 to i32
    %c0_i32_0 = arith.constant 0 : i32
    %2 = arith.cmpi ne, %1, %c0_i32_0 : i32
    scf.if %2 {
      %cst_17 = arith.constant 0.000000e+00 : f32
      %30 = vector.broadcast %cst_17 : f32 to vector<128x128xf32>
      %c0_18 = arith.constant 0 : index
      %c0_19 = arith.constant 0 : index
      %31 = vector.load %arg6[%c0_18, %c0_19] : memref<128x128xf32, #tpu.memory_space<vmem>>, vector<128x128xf32>
      tpu.vector_store %arg6[%c0_18, %c0_19], %30 {strides = array<i32>} : memref<128x128xf32, #tpu.memory_space<vmem>>, vector<128x128xf32>,
    } else {
    }
    %c0 = arith.constant 0 : index
    %c0_1 = arith.constant 0 : index
    %3 = vector.load %arg2[%c0, %c0_1] : memref<128x128xf32, #tpu.memory_space<vmem>>, vector<128x128xf32>
    %c0_2 = arith.constant 0 : index
    %c0_3 = arith.constant 0 : index
    %4 = vector.load %arg3[%c0_2, %c0_3] : memref<128x1024xf32, #tpu.memory_space<vmem>>, vector<128x1024xf32>
    %cst = arith.constant dense<0.000000e+00> : vector<128x1024xf32>
    %5 = tpu.matmul %3, %4, %cst {dimension_numbers = #tpu.dot_dimension_numbers<[1], [0], [0], [1], [0, 0, 1, 1], [], []>} : vector<128x128xf32>, vector<128x1024xf32>, vector<128x1024xf32> -> vector<128x1024xf32>
    %6 = vector.extract_strided_slice %5 {offsets = [0, 0], sizes = [128, 512], strides = [1, 1]} : vector<128x1024xf32> to vector<128x512xf32>
    %7 = vector.extract_strided_slice %5 {offsets = [0, 512], sizes = [128, 512], strides = [1, 1]} : vector<128x1024xf32> to vector<128x512xf32>
    %cst_4 = arith.constant 5.000000e-01 : f32
    %8 = vector.broadcast %cst_4 : f32 to vector<128x512xf32>
    %9 = arith.mulf %8, %6 : vector<128x512xf32>
    %cst_5 = arith.constant 4.471500e-02 : f32
    %10 = vector.broadcast %cst_5 : f32 to vector<128x512xf32>
    %11 = arith.mulf %10, %6 : vector<128x512xf32>
    %12 = arith.mulf %11, %6 : vector<128x512xf32>
    %13 = arith.mulf %12, %6 : vector<128x512xf32>
    %14 = arith.addf %6, %13 : vector<128x512xf32>
    %cst_6 = arith.constant 0.797884583 : f32
    %15 = vector.broadcast %cst_6 : f32 to vector<128x512xf32>
    %16 = arith.mulf %15, %14 : vector<128x512xf32>
    %17 = math.tanh %16 : vector<128x512xf32>
    %cst_7 = arith.constant 1.000000e+00 : f32
    %18 = vector.broadcast %cst_7 : f32 to vector<128x512xf32>
    %19 = arith.addf %18, %17 : vector<128x512xf32>
    %20 = arith.mulf %9, %19 : vector<128x512xf32>
    %21 = arith.mulf %20, %7 : vector<128x512xf32>
    %c0_8 = arith.constant 0 : index
    %c0_9 = arith.constant 0 : index
    %22 = vector.load %arg6[%c0_8, %c0_9] : memref<128x128xf32, #tpu.memory_space<vmem>>, vector<128x128xf32>
    %c0_10 = arith.constant 0 : index
    %c0_11 = arith.constant 0 : index
    %23 = vector.load %arg4[%c0_10, %c0_11] : memref<512x128xf32, #tpu.memory_space<vmem>>, vector<512x128xf32>
    %cst_12 = arith.constant dense<0.000000e+00> : vector<128x128xf32>
    %24 = tpu.matmul %21, %23, %cst_12 {dimension_numbers = #tpu.dot_dimension_numbers<[1], [0], [0], [1], [0, 0, 1, 1], [], []>} : vector<128x512xf32>, vector<512x128xf32>, vector<128x128xf32> -> vector<128x128xf32>
    %25 = arith.addf %22, %24 : vector<128x128xf32>
    %c0_13 = arith.constant 0 : index
    %c0_14 = arith.constant 0 : index
    %26 = vector.load %arg6[%c0_13, %c0_14] : memref<128x128xf32, #tpu.memory_space<vmem>>, vector<128x128xf32>
    tpu.vector_store %arg6[%c0_13, %c0_14], %25 {strides = array<i32>} : memref<128x128xf32, #tpu.memory_space<vmem>>, vector<128x128xf32>,
    %c0_i32_15 = arith.constant 0 : i32
    %27 = arith.cmpi eq, %arg1, %c0_i32_15 : i32
    %28 = arith.extui %27 : i1 to i32
    %c0_i32_16 = arith.constant 0 : i32
    %29 = arith.cmpi ne, %28, %c0_i32_16 : i32
    scf.if %29 {
      %c0_17 = arith.constant 0 : index
      %c0_18 = arith.constant 0 : index
      %30 = vector.load %arg6[%c0_17, %c0_18] : memref<128x128xf32, #tpu.memory_space<vmem>>, vector<128x128xf32>
      %c0_19 = arith.constant 0 : index
      %c0_20 = arith.constant 0 : index
      %31 = vector.load %arg5[%c0_19, %c0_20] : memref<128x128xf32, #tpu.memory_space<vmem>>, vector<128x128xf32>
      tpu.vector_store %arg5[%c0_19, %c0_20], %30 {strides = array<i32>} : memref<128x128xf32, #tpu.memory_space<vmem>>, vector<128x128xf32>,
    } else {
    }
    return
  }
  func.func @transform_0(%arg0: i32, %arg1: i32) -> (i32, i32) {
    %c0_i32 = arith.constant 0 : i32
    %c0_i32_0 = arith.constant 0 : i32
    return %arg0, %c0_i32 : i32, i32
  }
  func.func @transform_1(%arg0: i32, %arg1: i32) -> (i32, i32) {
    %c0_i32 = arith.constant 0 : i32
    %c0_i32_0 = arith.constant 0 : i32
    return %c0_i32, %arg1 : i32, i32
  }
  func.func @transform_2(%arg0: i32, %arg1: i32) -> (i32, i32) {
    %c0_i32 = arith.constant 0 : i32
    %c0_i32_0 = arith.constant 0 : i32
    return %arg1, %c0_i32 : i32, i32
  }
  func.func @transform_3(%arg0: i32, %arg1: i32) -> (i32, i32) {
    %c0_i32 = arith.constant 0 : i32
    %c0_i32_0 = arith.constant 0 : i32
    return %arg0, %c0_i32 : i32, i32
  }
}

</mosaic_0001>

<bundles_post_ra>
// kernel: tpu_custom_call.1
= control target key start
LH: loop header
LB: loop body
LE: loop exit
PB: predicated region body
PF: predicated region fallthrough
CT: control target
= control target key end

     0   :  { %8 = vsyncpa [#allocation4], 0  ;;  %s3610_s0 = inlined_call_operand.hbm [shape: f32[128,128], index: 0, kind: input, shape index: {}]   ;;  %s3611_s1 = inlined_call_operand.hbm [shape: f32[128,1024], index: 1, kind: input, shape index: {}]   ;;  %s3612_s2 = inlined_call_operand.hbm [shape: f32[512,128], index: 2, kind: input, shape index: {}]   ;;  %s3613_s3 = inlined_call_operand.hbm [shape: f32[128,128], index: 3, kind: output, shape index: {}]  }
   0x1   :  { %9 = vsyncpa [#allocation7], 0 }
   0x2   :  { %10 = vsyncpa [#allocation5], 0  ;;  %s2542_s12 = smov [#allocation6]   ;;  %s2448_s16 = scalar_lea.hbm %s3611_s1, 16384 }
   0x3   :  { %s28_s13 = sshll.u32 %s2542_s12, 4  ;;  %p2449_p0 = scmp.ne.s32.totalorder %s3611_s1, %s2448_s16  ;;  %s29_s13 = int_to_ptr.vmem [resolvable:$true] %s28_s13 }
   0x4   :  { %p2452_p1 = scmp.lt.u32.totalorder %s2448_s16, %s3611_s1 }
   0x6   :  { %p2454_p2 = pnand %p2452_p1, %p2449_p0 }
   0x8   :  { %2457 = shalt.err (!%p2454_p2)
}
   0x9   :  { %s2458_s21 = scalar_lea.vmem %s29_s13, 16384  ;;  %p2463_p4 = scmp.lt.s32.totalorder %s29_s13, %s29_s13 }
   0xa   :  { %p2459_p3 = scmp.ne.s32.totalorder %s29_s13, %s2458_s21  ;;  %p2464_p5 = scmp.lt.s32.totalorder %s2458_s21, %s2458_s21 }
   0xc   :  { %p2465_p6 = por %p2464_p5, %p2463_p4 }
   0xe   :  { %p2466_p7 = pnand %p2465_p6, %p2459_p3 }
  0x10   :  { %2469 = shalt.err (!%p2466_p7)
}
  0x11   :  { %s2543_s22 = smov 1024   ;;  %s2544_s23 = smov 64  }
  0x12   :  { %34 = dma.hbm_to_vmem [thread:$0]  %s3611_s1, 16384, %s29_s13, [#allocation7], %s2543_s22, %s2543_s22, %s2544_s23  }
  0x13   :  { %s2545_s26 = smov [#allocation3]   ;;  %s2470_s30 = scalar_lea.hbm %s3610_s0, 2048 }
  0x14   :  { %s16_s27 = sshll.u32 %s2545_s26, 4  ;;  %p2471_p8 = scmp.ne.s32.totalorder %s3610_s0, %s2470_s30  ;;  %s17_s27 = int_to_ptr.vmem [resolvable:$true] %s16_s27 }
  0x15   :  { %p2474_p9 = scmp.lt.u32.totalorder %s2470_s30, %s3610_s0 }
  0x17   :  { %p2476_p10 = pnand %p2474_p9, %p2471_p8 }
  0x19   :  { %2479 = shalt.err (!%p2476_p10)
}
  0x1a   :  { %s2480_s8 = scalar_lea.vmem %s17_s27, 2048  ;;  %p2485_p12 = scmp.lt.s32.totalorder %s17_s27, %s17_s27 }
  0x1b   :  { %p2481_p11 = scmp.ne.s32.totalorder %s17_s27, %s2480_s8  ;;  %p2486_p13 = scmp.lt.s32.totalorder %s2480_s8, %s2480_s8 }
  0x1d   :  { %p2487_p0 = por %p2486_p13, %p2485_p12 }
  0x1f   :  { %p2488_p1 = pnand %p2487_p0, %p2481_p11 }
  0x21   :  { %2491 = shalt.err (!%p2488_p1)
}
  0x22   :  { %s2546_s1 = smov 128   ;;  %s2547_s9 = smov 8  }
  0x23   :  { %22 = dma.hbm_to_vmem [thread:$0]  %s3610_s0, 2048, %s17_s27, [#allocation4], %s2546_s1, %s2546_s1, %s2547_s9  }
  0x24   :  { %s2548_s12 = smov [#allocation8]   ;;  %s2492_s16 = scalar_lea.hbm %s3612_s2, 8192 }
  0x25   :  { %s40_s13 = sshll.u32 %s2548_s12, 4  ;;  %p2493_p2 = scmp.ne.s32.totalorder %s3612_s2, %s2492_s16  ;;  %s41_s13 = int_to_ptr.vmem [resolvable:$true] %s40_s13 }
  0x26   :  { %p2496_p3 = scmp.lt.u32.totalorder %s2492_s16, %s3612_s2 }
  0x28   :  { %p2498_p4 = pnand %p2496_p3, %p2493_p2 }
  0x2a   :  { %2501 = shalt.err (!%p2498_p4)
}
  0x2b   :  { %s2502_s21 = scalar_lea.vmem %s41_s13, 8192  ;;  %p2507_p6 = scmp.lt.s32.totalorder %s41_s13, %s41_s13 }
  0x2c   :  { %p2503_p5 = scmp.ne.s32.totalorder %s41_s13, %s2502_s21  ;;  %p2508_p7 = scmp.lt.s32.totalorder %s2502_s21, %s2502_s21 }
  0x2e   :  { %p2509_p8 = por %p2508_p7, %p2507_p6 }
  0x30   :  { %p2510_p9 = pnand %p2509_p8, %p2503_p5 }
  0x32   :  { %2513 = shalt.err (!%p2510_p9)
}
  0x33   :  { %46 = dma.hbm_to_vmem [thread:$0]  %s3612_s2, 8192, %s41_s13, [#allocation7], %s2546_s1, %s2546_s1, %s2547_s9  }
  0x34   :  { %2536 = dma.done.wait [#allocation4], 2048  }
  0x35   :  { %2537 = vsyncadd [#allocation4], 4294965248 }
  0x36   :  { %2538 = dma.done.wait [#allocation7], 24576  }
  0x37   :  { %2539 = vsyncadd [#allocation7], 4294942720  ;;  %v2549_v0 = vmov 0.0   ;;  %v93_v1 = vld [vmem:[#allocation6 + $0x8] sm:$0xff]  ;;  %v95_v3 = vld [vmem:[#allocation6 + $0x18] sm:$0xff]  ;;  %s2550_s2 = smov [#allocation9]  }
  0x38   :  { %284 = vmatprep.mubr.f32.mxu0 %v2549_v0  ;;  %445 = vmatprep.mubr.f32.mxu1 %v2549_v0  ;;  %v101_v2 = vld [vmem:[#allocation6 + $0x48] sm:$0xff]  ;;  %v103_v5 = vld [vmem:[#allocation6 + $0x58] sm:$0xff]  ;;  %v92_v6 = vld [vmem:[#allocation6] sm:$0xff]  ;;  %s1946_s23 = sshll.u32 %s2550_s2, 4  ;;  %s1947_s23 = int_to_ptr.vmem [resolvable:$true] %s1946_s23 }
  0x39   :  { %v2119_v4 = vpack.c.bf16 %v101_v2, %v93_v1  ;;  %v100_v7 = vld [vmem:[#allocation6 + $0x40] sm:$0xff]  ;;  %v2151_v8 = vpack.c.bf16 %v103_v5, %v95_v3  ;;  %v94_v10 = vld [vmem:[#allocation6 + $0x10] sm:$0xff]  ;;  %v109_v12 = vld [vmem:[#allocation6 + $0x88] sm:$0xff]  ;;  %s2514_s24 = scalar_lea.vmem %s1947_s23, 2048  ;;  %p2519_p11 = scmp.lt.s32.totalorder %s1947_s23, %s1947_s23 }
  0x3a   :  { %v2121_v9 = vpack.c.bf16 %v100_v7, %v92_v6  ;;  %v102_v11 = vld [vmem:[#allocation6 + $0x50] sm:$0xff]  ;;  %v117_v14 = vld [vmem:[#allocation6 + $0xc8] sm:$0xff]  ;;  %v111_v15 = vld [vmem:[#allocation6 + $0x98] sm:$0xff]  ;;  %p2515_p10 = scmp.ne.s32.totalorder %s1947_s23, %s2514_s24  ;;  %p2520_p12 = scmp.lt.s32.totalorder %s2514_s24, %s2514_s24 }
  0x3b   :  { %2120 = vmatprep.subr.bf16.mxu0 %v2119_v4  ;;  %v2153_v13 = vpack.c.bf16 %v102_v11, %v94_v10  ;;  %v119_v16 = vld [vmem:[#allocation6 + $0xd8] sm:$0xff]  ;;  %2152 = vmatprep.subr.bf16.mxu1 %v2151_v8  ;;  %v2123_v17 = vpack.c.bf16 %v117_v14, %v109_v12  ;;  %v108_v19 = vld [vmem:[#allocation6 + $0x80] sm:$0xff]  ;;  %v110_v21 = vld [vmem:[#allocation6 + $0x90] sm:$0xff] }
  0x3c   :  { %2122 = vmatpush1.bf16.msra.mxu0 %v2121_v9  ;;  %v2155_v18 = vpack.c.bf16 %v119_v16, %v111_v15  ;;  %v116_v20 = vld [vmem:[#allocation6 + $0xc0] sm:$0xff]  ;;  %v118_v23 = vld [vmem:[#allocation6 + $0xd0] sm:$0xff]  ;;  %v125_v24 = vld [vmem:[#allocation6 + $0x108] sm:$0xff]  ;;  %p2521_p13 = por %p2520_p12, %p2519_p11 }
  0x3d   :  { %2154 = vmatpush1.bf16.msra.mxu1 %v2153_v13  ;;  %v2125_v22 = vpack.c.bf16 %v116_v20, %v108_v19  ;;  %v133_v25 = vld [vmem:[#allocation6 + $0x148] sm:$0xff]  ;;  %2124 = vmatprep.subr.bf16.mxu0 %v2123_v17  ;;  %v2157_v26 = vpack.c.bf16 %v118_v23, %v110_v21  ;;  %v127_v28 = vld [vmem:[#allocation6 + $0x118] sm:$0xff]  ;;  %v124_v30 = vld [vmem:[#allocation6 + $0x100] sm:$0xff] }
  0x3e   :  { %2156 = vmatprep.subr.bf16.mxu1 %v2155_v18  ;;  %v2127_v27 = vpack.c.bf16 %v133_v25, %v125_v24  ;;  %v135_v29 = vld [vmem:[#allocation6 + $0x158] sm:$0xff]  ;;  %v132_v32 = vld [vmem:[#allocation6 + $0x140] sm:$0xff]  ;;  %v126_v33 = vld [vmem:[#allocation6 + $0x110] sm:$0xff]  ;;  %p2522_p0 = pnand %p2521_p13, %p2515_p10 }
  0x3f   :  { %v2159_v31 = vpack.c.bf16 %v135_v29, %v127_v28  ;;  %v134_v34 = vld [vmem:[#allocation6 + $0x150] sm:$0xff]  ;;  %v2129_v35 = vpack.c.bf16 %v132_v32, %v124_v30  ;;  %v141_v36 = vld [vmem:[#allocation6 + $0x188] sm:$0xff]  ;;  %v143_v38 = vld [vmem:[#allocation6 + $0x198] sm:$0xff] }
  0x40   :  { %2126 = vmatpush1.bf16.msra.mxu0 %v2125_v22  ;;  %v149_v37 = vld [vmem:[#allocation6 + $0x1c8] sm:$0xff]  ;;  %v2161_v39 = vpack.c.bf16 %v134_v34, %v126_v33  ;;  %v151_v41 = vld [vmem:[#allocation6 + $0x1d8] sm:$0xff]  ;;  %v140_v42 = vld [vmem:[#allocation6 + $0x180] sm:$0xff] }
  0x41   :  { %2158 = vmatpush1.bf16.msra.mxu1 %v2157_v26  ;;  %2128 = vmatprep.subr.bf16.mxu0 %v2127_v27  ;;  %v2131_v40 = vpack.c.bf16 %v149_v37, %v141_v36  ;;  %v148_v43 = vld [vmem:[#allocation6 + $0x1c0] sm:$0xff]  ;;  %v2163_v44 = vpack.c.bf16 %v151_v41, %v143_v38  ;;  %v142_v45 = vld [vmem:[#allocation6 + $0x190] sm:$0xff]  ;;  %v157_v47 = vld [vmem:[#allocation6 + $0x208] sm:$0xff] }
  0x42   :  { %2160 = vmatprep.subr.bf16.mxu1 %v2159_v31  ;;  %v150_v46 = vld [vmem:[#allocation6 + $0x1d0] sm:$0xff]  ;;  %v165_v48 = vld [vmem:[#allocation6 + $0x248] sm:$0xff]  ;;  %v159_v49 = vld [vmem:[#allocation6 + $0x218] sm:$0xff]  ;;  %v2133_v51 = vpack.c.bf16 %v148_v43, %v140_v42 }
  0x43   :  { %v167_v50 = vld [vmem:[#allocation6 + $0x258] sm:$0xff]  ;;  %v2165_v52 = vpack.c.bf16 %v150_v46, %v142_v45  ;;  %v2135_v53 = vpack.c.bf16 %v165_v48, %v157_v47  ;;  %v156_v54 = vld [vmem:[#allocation6 + $0x200] sm:$0xff]  ;;  %v158_v56 = vld [vmem:[#allocation6 + $0x210] sm:$0xff] }
  0x44   :  { %2130 = vmatpush1.bf16.msra.mxu0 %v2129_v35  ;;  %v164_v55 = vld [vmem:[#allocation6 + $0x240] sm:$0xff]  ;;  %v2167_v57 = vpack.c.bf16 %v167_v50, %v159_v49  ;;  %v166_v58 = vld [vmem:[#allocation6 + $0x250] sm:$0xff]  ;;  %v173_v59 = vld [vmem:[#allocation6 + $0x288] sm:$0xff] }
  0x45   :  { %2162 = vmatpush1.bf16.msra.mxu1 %v2161_v39  ;;  %2132 = vmatprep.subr.bf16.mxu0 %v2131_v40  ;;  %v181_v60 = vld [vmem:[#allocation6 + $0x2c8] sm:$0xff]  ;;  %v175_v61 = vld [vmem:[#allocation6 + $0x298] sm:$0xff]  ;;  %v2137_v63 = vpack.c.bf16 %v164_v55, %v156_v54  ;;  %v2169_v1 = vpack.c.bf16 %v166_v58, %v158_v56  ;;  %v172_v3 = vld [vmem:[#allocation6 + $0x280] sm:$0xff] }
  0x46   :  { %2164 = vmatprep.subr.bf16.mxu1 %v2163_v44  ;;  %v183_v62 = vld [vmem:[#allocation6 + $0x2d8] sm:$0xff]  ;;  %v2139_v2 = vpack.c.bf16 %v181_v60, %v173_v59  ;;  %v180_v4 = vld [vmem:[#allocation6 + $0x2c0] sm:$0xff]  ;;  %v174_v5 = vld [vmem:[#allocation6 + $0x290] sm:$0xff] }
  0x47   :  { %v2171_v6 = vpack.c.bf16 %v183_v62, %v175_v61  ;;  %v182_v7 = vld [vmem:[#allocation6 + $0x2d0] sm:$0xff]  ;;  %v189_v8 = vld [vmem:[#allocation6 + $0x308] sm:$0xff]  ;;  %v191_v10 = vld [vmem:[#allocation6 + $0x318] sm:$0xff]  ;;  %v2141_v12 = vpack.c.bf16 %v180_v4, %v172_v3 }
  0x48   :  { %2134 = vmatpush1.bf16.msra.mxu0 %v2133_v51  ;;  %v197_v9 = vld [vmem:[#allocation6 + $0x348] sm:$0xff]  ;;  %v199_v11 = vld [vmem:[#allocation6 + $0x358] sm:$0xff]  ;;  %v2173_v13 = vpack.c.bf16 %v182_v7, %v174_v5  ;;  %v188_v15 = vld [vmem:[#allocation6 + $0x300] sm:$0xff] }
  0x49   :  { %2166 = vmatpush1.bf16.msra.mxu1 %v2165_v52  ;;  %2136 = vmatprep.subr.bf16.mxu0 %v2135_v53  ;;  %v2143_v14 = vpack.c.bf16 %v197_v9, %v189_v8  ;;  %v196_v16 = vld [vmem:[#allocation6 + $0x340] sm:$0xff]  ;;  %v190_v17 = vld [vmem:[#allocation6 + $0x310] sm:$0xff]  ;;  %v2175_v18 = vpack.c.bf16 %v199_v11, %v191_v10  ;;  %v205_v20 = vld [vmem:[#allocation6 + $0x388] sm:$0xff] }
  0x4a   :  { %2168 = vmatprep.subr.bf16.mxu1 %v2167_v57  ;;  %v198_v19 = vld [vmem:[#allocation6 + $0x350] sm:$0xff]  ;;  %v213_v21 = vld [vmem:[#allocation6 + $0x3c8] sm:$0xff]  ;;  %v207_v22 = vld [vmem:[#allocation6 + $0x398] sm:$0xff]  ;;  %v2145_v24 = vpack.c.bf16 %v196_v16, %v188_v15 }
  0x4b   :  { %v215_v23 = vld [vmem:[#allocation6 + $0x3d8] sm:$0xff]  ;;  %v2177_v25 = vpack.c.bf16 %v198_v19, %v190_v17  ;;  %v2147_v26 = vpack.c.bf16 %v213_v21, %v205_v20  ;;  %v204_v27 = vld [vmem:[#allocation6 + $0x380] sm:$0xff]  ;;  %v206_v29 = vld [vmem:[#allocation6 + $0x390] sm:$0xff] }
  0x4c   :  { %2138 = vmatpush1.bf16.msra.mxu0 %v2137_v63  ;;  %v212_v28 = vld [vmem:[#allocation6 + $0x3c0] sm:$0xff]  ;;  %v2179_v30 = vpack.c.bf16 %v215_v23, %v207_v22  ;;  %v214_v31 = vld [vmem:[#allocation6 + $0x3d0] sm:$0xff]  ;;  %v97_v32 = vld [vmem:[#allocation6 + $0x28] sm:$0xff] }
  0x4d   :  { %2170 = vmatpush1.bf16.msra.mxu1 %v2169_v1  ;;  %2140 = vmatprep.subr.bf16.mxu0 %v2139_v2  ;;  %v105_v33 = vld [vmem:[#allocation6 + $0x68] sm:$0xff]  ;;  %v99_v34 = vld [vmem:[#allocation6 + $0x38] sm:$0xff]  ;;  %v2149_v36 = vpack.c.bf16 %v212_v28, %v204_v27  ;;  %v2181_v37 = vpack.c.bf16 %v214_v31, %v206_v29  ;;  %v96_v39 = vld [vmem:[#allocation6 + $0x20] sm:$0xff] }
  0x4e   :  { %2172 = vmatprep.subr.bf16.mxu1 %v2171_v6  ;;  %v107_v35 = vld [vmem:[#allocation6 + $0x78] sm:$0xff]  ;;  %v2183_v38 = vpack.c.bf16 %v105_v33, %v97_v32  ;;  %v104_v40 = vld [vmem:[#allocation6 + $0x60] sm:$0xff]  ;;  %v98_v42 = vld [vmem:[#allocation6 + $0x30] sm:$0xff] }
  0x4f   :  { %v2215_v41 = vpack.c.bf16 %v107_v35, %v99_v34  ;;  %v106_v43 = vld [vmem:[#allocation6 + $0x70] sm:$0xff]  ;;  %v113_v44 = vld [vmem:[#allocation6 + $0xa8] sm:$0xff]  ;;  %v2615_v46 = vld [vmem:[#allocation3] sm:$0xff]  ;;  %v2185_v47 = vpack.c.bf16 %v104_v40, %v96_v39 }
  0x50   :  { %2142 = vmatpush1.bf16.msra.mxu0 %v2141_v12  ;;  %v121_v45 = vld [vmem:[#allocation6 + $0xe8] sm:$0xff]  ;;  %v115_v48 = vld [vmem:[#allocation6 + $0xb8] sm:$0xff]  ;;  %v2217_v50 = vpack.c.bf16 %v106_v43, %v98_v42  ;;  %v112_v52 = vld [vmem:[#allocation6 + $0xa0] sm:$0xff] }
  0x51   :  { %2174 = vmatpush1.bf16.msra.mxu1 %v2173_v13  ;;  %2144 = vmatprep.subr.bf16.mxu0 %v2143_v14  ;;  %v123_v49 = vld [vmem:[#allocation6 + $0xf8] sm:$0xff]  ;;  %v2187_v51 = vpack.c.bf16 %v121_v45, %v113_v44  ;;  %v120_v53 = vld [vmem:[#allocation6 + $0xe0] sm:$0xff]  ;;  %v114_v54 = vld [vmem:[#allocation6 + $0xb0] sm:$0xff] }
  0x52   :  { %2176 = vmatprep.subr.bf16.mxu1 %v2175_v18  ;;  %v2219_v55 = vpack.c.bf16 %v123_v49, %v115_v48  ;;  %v122_v56 = vld [vmem:[#allocation6 + $0xf0] sm:$0xff]  ;;  %v129_v57 = vld [vmem:[#allocation6 + $0x128] sm:$0xff]  ;;  %v131_v60 = vld [vmem:[#allocation6 + $0x138] sm:$0xff]  ;;  %v2189_v62 = vpack.c.bf16 %v120_v53, %v112_v52 }
  0x53   :  { %v137_v58 = vld [vmem:[#allocation6 + $0x168] sm:$0xff]  ;;  %v139_v61 = vld [vmem:[#allocation6 + $0x178] sm:$0xff]  ;;  %v2221_v63 = vpack.c.bf16 %v122_v56, %v114_v54  ;;  %v128_v2 = vld [vmem:[#allocation6 + $0x120] sm:$0xff] }
  0x54   :  { %2146 = vmatpush1.bf16.msra.mxu0 %v2145_v24  ;;  %v2619_v59 = vld [vmem:[#allocation3 + $0x8] sm:$0xff]  ;;  %v2191_v1 = vpack.c.bf16 %v137_v58, %v129_v57  ;;  %v136_v3 = vld [vmem:[#allocation6 + $0x160] sm:$0xff]  ;;  %v130_v4 = vld [vmem:[#allocation6 + $0x130] sm:$0xff]  ;;  %v2223_v5 = vpack.c.bf16 %v139_v61, %v131_v60 }
  0x55   :  { %2178 = vmatpush1.bf16.msra.mxu1 %v2177_v25  ;;  %2148 = vmatprep.subr.bf16.mxu0 %v2147_v26  ;;  %v138_v6 = vld [vmem:[#allocation6 + $0x170] sm:$0xff]  ;;  %v145_v7 = vld [vmem:[#allocation6 + $0x1a8] sm:$0xff]  ;;  %v147_v10 = vld [vmem:[#allocation6 + $0x1b8] sm:$0xff]  ;;  %v2193_v12 = vpack.c.bf16 %v136_v3, %v128_v2 }
  0x56   :  { %2180 = vmatprep.subr.bf16.mxu1 %v2179_v30  ;;  %v153_v8 = vld [vmem:[#allocation6 + $0x1e8] sm:$0xff]  ;;  %v2626_v9 = vld [vmem:[#allocation3 + $0x10] sm:$0xff]  ;;  %v155_v11 = vld [vmem:[#allocation6 + $0x1f8] sm:$0xff]  ;;  %v2225_v13 = vpack.c.bf16 %v138_v6, %v130_v4 }
  0x57   :  { %v2195_v14 = vpack.c.bf16 %v153_v8, %v145_v7  ;;  %v144_v15 = vld [vmem:[#allocation6 + $0x1a0] sm:$0xff]  ;;  %v146_v17 = vld [vmem:[#allocation6 + $0x1b0] sm:$0xff]  ;;  %v2227_v18 = vpack.c.bf16 %v155_v11, %v147_v10  ;;  %v161_v20 = vld [vmem:[#allocation6 + $0x228] sm:$0xff] }
  0x58   :  { %2150 = vmatpush1.bf16.msra.mxu0 %v2149_v36  ;;  %v152_v16 = vld [vmem:[#allocation6 + $0x1e0] sm:$0xff]  ;;  %v154_v19 = vld [vmem:[#allocation6 + $0x1f0] sm:$0xff]  ;;  %v169_v21 = vld [vmem:[#allocation6 + $0x268] sm:$0xff] }
  0x59   :  { %2182 = vmatpush1.bf16.msra.mxu1 %v2181_v37  ;;  %2184 = vmatprep.subr.bf16.mxu0 %v2183_v38  ;;  %v2632_v22 = vld [vmem:[#allocation3 + $0x18] sm:$0xff]  ;;  %v2197_v25 = vpack.c.bf16 %v152_v16, %v144_v15  ;;  %v2229_v26 = vpack.c.bf16 %v154_v19, %v146_v17  ;;  %v2199_v27 = vpack.c.bf16 %v169_v21, %v161_v20  ;;  %v160_v28 = vld [vmem:[#allocation6 + $0x220] sm:$0xff]  ;;  %v162_v30 = vld [vmem:[#allocation6 + $0x230] sm:$0xff] }
  0x5a   :  { %2216 = vmatprep.subr.bf16.mxu1 %v2215_v41  ;;  %v163_v23 = vld [vmem:[#allocation6 + $0x238] sm:$0xff]  ;;  %v168_v29 = vld [vmem:[#allocation6 + $0x260] sm:$0xff]  ;;  %v170_v32 = vld [vmem:[#allocation6 + $0x270] sm:$0xff] }
  0x5b   :  { %285 = vmatmul.mubr.f32.vlgmr.msra.gmra.mrb[0].mxu0 %v2615_v46  ;;  %v171_v24 = vld [vmem:[#allocation6 + $0x278] sm:$0xff]  ;;  %v177_v33 = vld [vmem:[#allocation6 + $0x2a8] sm:$0xff]  ;;  %v2638_v35 = vld [vmem:[#allocation3 + $0x20] sm:$0xff]  ;;  %v2201_v38 = vpack.c.bf16 %v168_v29, %v160_v28  ;;  %v2233_v39 = vpack.c.bf16 %v170_v32, %v162_v30 }
  0x5c   :  { %446 = vmatmul.mubr.f32.vlgmr.msra.gmra.mrb[0].mxu1 %v2615_v46  ;;  %2186 = vmatpush1.bf16.msra.mxu0 %v2185_v47  ;;  %v2231_v31 = vpack.c.bf16 %v171_v24, %v163_v23  ;;  %v185_v34 = vld [vmem:[#allocation6 + $0x2e8] sm:$0xff]  ;;  %v179_v36 = vld [vmem:[#allocation6 + $0x2b8] sm:$0xff]  ;;  %v176_v41 = vld [vmem:[#allocation6 + $0x2a0] sm:$0xff] }
  0x5d   :  { %2218 = vmatpush1.bf16.msra.mxu1 %v2217_v50  ;;  %290 = vmatprep.mubr.f32.mxu0 %v2549_v0  ;;  %v187_v37 = vld [vmem:[#allocation6 + $0x2f8] sm:$0xff]  ;;  %v2203_v40 = vpack.c.bf16 %v185_v34, %v177_v33  ;;  %v184_v42 = vld [vmem:[#allocation6 + $0x2e0] sm:$0xff]  ;;  %v178_v43 = vld [vmem:[#allocation6 + $0x2b0] sm:$0xff] }
  0x5e   :  { %451 = vmatprep.mubr.f32.mxu1 %v2549_v0  ;;  %2188 = vmatprep.subr.bf16.mxu0 %v2187_v51  ;;  %v2235_v44 = vpack.c.bf16 %v187_v37, %v179_v36  ;;  %v186_v45 = vld [vmem:[#allocation6 + $0x2f0] sm:$0xff]  ;;  %v193_v47 = vld [vmem:[#allocation6 + $0x328] sm:$0xff]  ;;  %v195_v50 = vld [vmem:[#allocation6 + $0x338] sm:$0xff]  ;;  %v2205_v52 = vpack.c.bf16 %v184_v42, %v176_v41 }
  0x5f   :  { %291 = vmatmul.mubr.f32.gmra.mrb[2].mxu0 %v2619_v59  ;;  %2220 = vmatprep.subr.bf16.mxu1 %v2219_v55  ;;  %v201_v48 = vld [vmem:[#allocation6 + $0x368] sm:$0xff]  ;;  %v203_v51 = vld [vmem:[#allocation6 + $0x378] sm:$0xff]  ;;  %v2237_v53 = vpack.c.bf16 %v186_v45, %v178_v43  ;;  %v192_v55 = vld [vmem:[#allocation6 + $0x320] sm:$0xff] }
  0x60   :  { %452 = vmatmul.mubr.f32.gmra.mrb[2].mxu1 %v2619_v59  ;;  %296 = vmatprep.mubr.f32.mxu0 %v2549_v0  ;;  %v2644_v49 = vld [vmem:[#allocation3 + $0x28] sm:$0xff]  ;;  %v2207_v54 = vpack.c.bf16 %v201_v48, %v193_v47  ;;  %v200_v56 = vld [vmem:[#allocation6 + $0x360] sm:$0xff]  ;;  %v194_v57 = vld [vmem:[#allocation6 + $0x330] sm:$0xff]  ;;  %v2239_v58 = vpack.c.bf16 %v203_v51, %v195_v50 }
  0x61   :  { %457 = vmatprep.mubr.f32.mxu1 %v2549_v0  ;;  %2190 = vmatpush1.bf16.msra.mxu0 %v2189_v62  ;;  %v202_v60 = vld [vmem:[#allocation6 + $0x370] sm:$0xff]  ;;  %v209_v61 = vld [vmem:[#allocation6 + $0x3a8] sm:$0xff]  ;;  %v219_v2 = vld [vmem:[#allocation6 + $0x3f8] sm:$0xff]  ;;  %v2209_v3 = vpack.c.bf16 %v200_v56, %v192_v55 }
  0x62   :  { %2222 = vmatpush1.bf16.msra.mxu1 %v2221_v63  ;;  %2192 = vmatprep.subr.bf16.mxu0 %v2191_v1  ;;  %v217_v62 = vld [vmem:[#allocation6 + $0x3e8] sm:$0xff]  ;;  %v2650_v63 = vld [vmem:[#allocation3 + $0x30] sm:$0xff]  ;;  %v211_v1 = vld [vmem:[#allocation6 + $0x3b8] sm:$0xff]  ;;  %v2241_v4 = vpack.c.bf16 %v202_v60, %v194_v57 }
  0x63   :  { %297 = vmatmul.mubr.f32.gmra.mrb[4].mxu0 %v2626_v9  ;;  %2224 = vmatprep.subr.bf16.mxu1 %v2223_v5  ;;  %v2211_v5 = vpack.c.bf16 %v217_v62, %v209_v61  ;;  %v208_v6 = vld [vmem:[#allocation6 + $0x3a0] sm:$0xff]  ;;  %v2243_v8 = vpack.c.bf16 %v219_v2, %v211_v1  ;;  %v210_v10 = vld [vmem:[#allocation6 + $0x3b0] sm:$0xff]  ;;  %v2668_v16 = vld [vmem:[#allocation3 + $0x48] sm:$0xff] }
  0x64   :  { %458 = vmatmul.mubr.f32.gmra.mrb[4].mxu1 %v2626_v9  ;;  %302 = vmatprep.mubr.f32.mxu0 %v2549_v0  ;;  %v216_v7 = vld [vmem:[#allocation6 + $0x3e0] sm:$0xff]  ;;  %v218_v11 = vld [vmem:[#allocation6 + $0x3f0] sm:$0xff]  ;;  %v2692_v20 = vld [vmem:[#allocation3 + $0x68] sm:$0xff] }
  0x65   :  { %463 = vmatprep.mubr.f32.mxu1 %v2549_v0  ;;  %2194 = vmatpush1.bf16.msra.mxu0 %v2193_v12  ;;  %v2656_v12 = vld [vmem:[#allocation3 + $0x38] sm:$0xff]  ;;  %v2662_v15 = vld [vmem:[#allocation3 + $0x40] sm:$0xff]  ;;  %v2674_v17 = vld [vmem:[#allocation3 + $0x50] sm:$0xff] }
  0x66   :  { %2226 = vmatpush1.bf16.msra.mxu1 %v2225_v13  ;;  %2196 = vmatprep.subr.bf16.mxu0 %v2195_v14  ;;  %v2213_v13 = vpack.c.bf16 %v216_v7, %v208_v6  ;;  %v2245_v14 = vpack.c.bf16 %v218_v11, %v210_v10  ;;  %v2686_v19 = vld [vmem:[#allocation3 + $0x60] sm:$0xff]  ;;  %v2698_v21 = vld [vmem:[#allocation3 + $0x70] sm:$0xff]  ;;  %v2704_v23 = vld [vmem:[#allocation3 + $0x78] sm:$0xff] }
  0x67   :  { %303 = vmatmul.mubr.f32.gmra.mrb[6].mxu0 %v2632_v22  ;;  %2228 = vmatprep.subr.bf16.mxu1 %v2227_v18  ;;  %v2680_v18 = vld [vmem:[#allocation3 + $0x58] sm:$0xff]  ;;  %v1569_v24 = vld [vmem:[#allocation8 + $0x188] sm:$0xff]  ;;  %v1552_v29 = vld [vmem:[#allocation8 + $0x100] sm:$0xff] }
  0x68   :  { %464 = vmatmul.mubr.f32.gmra.mrb[6].mxu1 %v2632_v22  ;;  %308 = vmatprep.mubr.f32.mxu0 %v2549_v0  ;;  %v1553_v30 = vld [vmem:[#allocation8 + $0x108] sm:$0xff]  ;;  %v1538_v32 = vld [vmem:[#allocation8 + $0x90] sm:$0xff]  ;;  %v1539_v33 = vld [vmem:[#allocation8 + $0x98] sm:$0xff] }
  0x69   :  { %469 = vmatprep.mubr.f32.mxu1 %v2549_v0  ;;  %2198 = vmatpush1.bf16.msra.mxu0 %v2197_v25  ;;  %v1520_v25 = vld [vmem:[#allocation8] sm:$0xff]  ;;  %v1570_v34 = vld [vmem:[#allocation8 + $0x190] sm:$0xff]  ;;  %v1571_v36 = vld [vmem:[#allocation8 + $0x198] sm:$0xff] }
  0x6a   :  { %2230 = vmatpush1.bf16.msra.mxu1 %v2229_v26  ;;  %2200 = vmatprep.subr.bf16.mxu0 %v2199_v27  ;;  %v1521_v26 = vld [vmem:[#allocation8 + $0x8] sm:$0xff]  ;;  %v1522_v37 = vld [vmem:[#allocation8 + $0x10] sm:$0xff]  ;;  %v1555_v42 = vld [vmem:[#allocation8 + $0x118] sm:$0xff] }
  0x6b   :  { %309 = vmatmul.mubr.f32.gmra.mrb[8].mxu0 %v2638_v35  ;;  %2232 = vmatprep.subr.bf16.mxu1 %v2231_v31  ;;  %v2249_v28 = vpack.c.bf16 %v1521_v26, %v1520_v25  ;;  %v2281_v31 = vpack.c.bf16 %v1553_v30, %v1552_v29  ;;  %v1554_v41 = vld [vmem:[#allocation8 + $0x110] sm:$0xff]  ;;  %v1541_v45 = vld [vmem:[#allocation8 + $0xa8] sm:$0xff]  ;;  %v1572_v47 = vld [vmem:[#allocation8 + $0x1a0] sm:$0xff] }
  0x6c   :  { %470 = vmatmul.mubr.f32.gmra.mrb[8].mxu1 %v2638_v35  ;;  %314 = vmatprep.mubr.f32.mxu0 %v2549_v0  ;;  %v2285_v43 = vpack.c.bf16 %v1555_v42, %v1554_v41  ;;  %v1524_v50 = vld [vmem:[#allocation8 + $0x20] sm:$0xff]  ;;  %v1525_v51 = vld [vmem:[#allocation8 + $0x28] sm:$0xff]  ;;  %v1542_v57 = vld [vmem:[#allocation8 + $0xb0] sm:$0xff] }
  0x6d   :  { %475 = vmatprep.mubr.f32.mxu1 %v2549_v0  ;;  %2202 = vmatpush1.bf16.msra.mxu0 %v2201_v38  ;;  %v1523_v38 = vld [vmem:[#allocation8 + $0x18] sm:$0xff]  ;;  %v1557_v55 = vld [vmem:[#allocation8 + $0x128] sm:$0xff]  ;;  %v1574_v60 = vld [vmem:[#allocation8 + $0x1b0] sm:$0xff] }
  0x6e   :  { %2234 = vmatpush1.bf16.msra.mxu1 %v2233_v39  ;;  %2204 = vmatprep.subr.bf16.mxu0 %v2203_v40  ;;  %v2283_v39 = vpack.c.bf16 %v1571_v36, %v1570_v34  ;;  %v2253_v40 = vpack.c.bf16 %v1523_v38, %v1522_v37  ;;  %v1575_v62 = vld [vmem:[#allocation8 + $0x1b8] sm:$0xff]  ;;  %v1544_v7 = vld [vmem:[#allocation8 + $0xc0] sm:$0xff]  ;;  %v1562_v25 = vld [vmem:[#allocation8 + $0x150] sm:$0xff] }
  0x6f   :  { %315 = vmatmul.mubr.f32.gmra.mrb[10].mxu0 %v2644_v49  ;;  %2236 = vmatprep.subr.bf16.mxu1 %v2235_v44  ;;  %v1540_v44 = vld [vmem:[#allocation8 + $0xa0] sm:$0xff]  ;;  %v1527_v1 = vld [vmem:[#allocation8 + $0x38] sm:$0xff]  ;;  %v2291_v2 = vpack.c.bf16 %v1575_v62, %v1574_v60  ;;  %v1549_v29 = vld [vmem:[#allocation8 + $0xe8] sm:$0xff] }
  0x70   :  { %476 = vmatmul.mubr.f32.gmra.mrb[10].mxu1 %v2644_v49  ;;  %320 = vmatprep.mubr.f32.mxu0 %v2549_v0  ;;  %v2255_v48 = vpack.c.bf16 %v1541_v45, %v1540_v44  ;;  %v1576_v10 = vld [vmem:[#allocation8 + $0x1c0] sm:$0xff]  ;;  %v1563_v26 = vld [vmem:[#allocation8 + $0x158] sm:$0xff]  ;;  %v1533_v34 = vld [vmem:[#allocation8 + $0x68] sm:$0xff] }
  0x71   :  { %481 = vmatprep.mubr.f32.mxu1 %v2549_v0  ;;  %2206 = vmatpush1.bf16.msra.mxu0 %v2205_v52  ;;  %v1580_v30 = vld [vmem:[#allocation8 + $0x1e0] sm:$0xff]  ;;  %v1565_v38 = vld [vmem:[#allocation8 + $0x168] sm:$0xff]  ;;  %v1551_v41 = vld [vmem:[#allocation8 + $0xf8] sm:$0xff] }
  0x72   :  { %2238 = vmatpush1.bf16.msra.mxu1 %v2237_v53  ;;  %2208 = vmatprep.subr.bf16.mxu0 %v2207_v54  ;;  %v2257_v53 = vpack.c.bf16 %v1525_v51, %v1524_v50  ;;  %v1556_v54 = vld [vmem:[#allocation8 + $0x120] sm:$0xff]  ;;  %v1582_v42 = vld [vmem:[#allocation8 + $0x1f0] sm:$0xff]  ;;  %v1583_v44 = vld [vmem:[#allocation8 + $0x1f8] sm:$0xff] }
  0x73   :  { %321 = vmatmul.mubr.f32.gmra.mrb[12].mxu0 %v2650_v63  ;;  %2240 = vmatprep.subr.bf16.mxu1 %v2239_v58  ;;  %v2289_v56 = vpack.c.bf16 %v1557_v55, %v1556_v54  ;;  %v1543_v58 = vld [vmem:[#allocation8 + $0xb8] sm:$0xff]  ;;  %v1564_v37 = vld [vmem:[#allocation8 + $0x160] sm:$0xff]  ;;  %v1534_v45 = vld [vmem:[#allocation8 + $0x70] sm:$0xff] }
  0x74   :  { %482 = vmatmul.mubr.f32.gmra.mrb[12].mxu1 %v2650_v63  ;;  %326 = vmatprep.mubr.f32.mxu0 %v2549_v0  ;;  %v2259_v61 = vpack.c.bf16 %v1543_v58, %v1542_v57  ;;  %v1566_v50 = vld [vmem:[#allocation8 + $0x170] sm:$0xff]  ;;  %v1567_v51 = vld [vmem:[#allocation8 + $0x178] sm:$0xff] }
  0x75   :  { %487 = vmatprep.mubr.f32.mxu1 %v2549_v0  ;;  %2210 = vmatpush1.bf16.msra.mxu0 %v2209_v3 }
  0x76   :  { %2242 = vmatpush1.bf16.msra.mxu1 %v2241_v4  ;;  %2212 = vmatprep.subr.bf16.mxu0 %v2211_v5  ;;  %v1558_v4 = vld [vmem:[#allocation8 + $0x130] sm:$0xff]  ;;  %v1559_v5 = vld [vmem:[#allocation8 + $0x138] sm:$0xff] }
  0x77   :  { %327 = vmatmul.mubr.f32.gmra.mrb[14].mxu0 %v2656_v12  ;;  %2244 = vmatprep.subr.bf16.mxu1 %v2243_v8  ;;  %v2293_v6 = vpack.c.bf16 %v1559_v5, %v1558_v4  ;;  %v1545_v8 = vld [vmem:[#allocation8 + $0xc8] sm:$0xff] }
  0x78   :  { %488 = vmatmul.mubr.f32.gmra.mrb[14].mxu1 %v2656_v12  ;;  %332 = vmatprep.mubr.f32.mxu0 %v2549_v0  ;;  %v2263_v11 = vpack.c.bf16 %v1545_v8, %v1544_v7 }
  0x79   :  { %493 = vmatprep.mubr.f32.mxu1 %v2549_v0  ;;  %2214 = vmatpush1.bf16.msra.mxu0 %v2213_v13  ;;  %v1528_v13 = vld [vmem:[#allocation8 + $0x40] sm:$0xff] }
  0x7a   :  { %2246 = vmatpush1.bf16.msra.mxu1 %v2245_v14  ;;  %v1529_v14 = vld [vmem:[#allocation8 + $0x48] sm:$0xff] }
  0x7b   :  { %333 = vmatmul.mubr.f32.gmra.mrb[16].mxu0 %v2662_v15 }
  0x7c   :  { %494 = vmatmul.mubr.f32.gmra.mrb[16].mxu1 %v2662_v15  ;;  %338 = vmatprep.mubr.f32.mxu0 %v2549_v0 }
  0x7d   :  { %499 = vmatprep.mubr.f32.mxu1 %v2549_v0 }
  0x7f   :  { %339 = vmatmul.mubr.f32.gmra.mrb[18].mxu0 %v2668_v16 }
  0x80   :  { %500 = vmatmul.mubr.f32.gmra.mrb[18].mxu1 %v2668_v16  ;;  %344 = vmatprep.mubr.f32.mxu0 %v2549_v0 }
  0x81   :  { %505 = vmatprep.mubr.f32.mxu1 %v2549_v0 }
  0x83   :  { %345 = vmatmul.mubr.f32.gmra.mrb[20].mxu0 %v2674_v17 }
  0x84   :  { %506 = vmatmul.mubr.f32.gmra.mrb[20].mxu1 %v2674_v17  ;;  %350 = vmatprep.mubr.f32.mxu0 %v2549_v0 }
  0x85   :  { %511 = vmatprep.mubr.f32.mxu1 %v2549_v0 }
  0x87   :  { %351 = vmatmul.mubr.f32.gmra.mrb[22].mxu0 %v2680_v18 }
  0x88   :  { %512 = vmatmul.mubr.f32.gmra.mrb[22].mxu1 %v2680_v18  ;;  %356 = vmatprep.mubr.f32.mxu0 %v2549_v0 }
  0x89   :  { %517 = vmatprep.mubr.f32.mxu1 %v2549_v0 }
  0x8b   :  { %357 = vmatmul.mubr.f32.gmra.mrb[24].mxu0 %v2686_v19 }
  0x8c   :  { %518 = vmatmul.mubr.f32.gmra.mrb[24].mxu1 %v2686_v19  ;;  %362 = vmatprep.mubr.f32.mxu0 %v2549_v0 }
  0x8d   :  { %523 = vmatprep.mubr.f32.mxu1 %v2549_v0 }
  0x8f   :  { %363 = vmatmul.mubr.f32.gmra.mrb[26].mxu0 %v2692_v20 }
  0x90   :  { %524 = vmatmul.mubr.f32.gmra.mrb[26].mxu1 %v2692_v20  ;;  %368 = vmatprep.mubr.f32.mxu0 %v2549_v0 }
  0x91   :  { %529 = vmatprep.mubr.f32.mxu1 %v2549_v0 }
  0x93   :  { %369 = vmatmul.mubr.f32.gmra.mrb[28].mxu0 %v2698_v21 }
  0x94   :  { %530 = vmatmul.mubr.f32.gmra.mrb[28].mxu1 %v2698_v21  ;;  %374 = vmatprep.mubr.f32.mxu0 %v2549_v0 }
  0x95   :  { %535 = vmatprep.mubr.f32.mxu1 %v2549_v0 }
  0x97   :  { %375 = vmatmul.mubr.f32.gmra.mrb[30].mxu0 %v2704_v23 }
  0x98   :  { %536 = vmatmul.mubr.f32.gmra.mrb[30].mxu1 %v2704_v23  ;;  %606 = vmatprep.mubr.f32.mxu0 %v2549_v0 }
  0x99   :  { %767 = vmatprep.mubr.f32.mxu1 %v2549_v0 }
  0x9b   :  { %607 = vmatmul.mubr.f32.vlgmr.msra.gmra.mrb[32].mxu0 %v2615_v46 }
  0x9c   :  { %768 = vmatmul.mubr.f32.vlgmr.msra.gmra.mrb[32].mxu1 %v2615_v46  ;;  %612 = vmatprep.mubr.f32.mxu0 %v2549_v0  ;;  %v1536_v46 = vld [vmem:[#allocation8 + $0x80] sm:$0xff] }
  0x9d   :  { %773 = vmatprep.mubr.f32.mxu1 %v2549_v0 }
  0x9f   :  { %613 = vmatmul.mubr.f32.gmra.mrb[34].mxu0 %v2619_v59 }
  0xa0   :  { %774 = vmatmul.mubr.f32.gmra.mrb[34].mxu1 %v2619_v59  ;;  %618 = vmatprep.mubr.f32.mxu0 %v2549_v0  ;;  %v1537_v59 = vld [vmem:[#allocation8 + $0x88] sm:$0xff] }
  0xa1   :  { %779 = vmatprep.mubr.f32.mxu1 %v2549_v0 }
  0xa3   :  { %619 = vmatmul.mubr.f32.gmra.mrb[36].mxu0 %v2626_v9 }
  0xa4   :  { %780 = vmatmul.mubr.f32.gmra.mrb[36].mxu1 %v2626_v9  ;;  %624 = vmatprep.mubr.f32.mxu0 %v2549_v0  ;;  %v1568_v9 = vld [vmem:[#allocation8 + $0x180] sm:$0xff] }
  0xa5   :  { %785 = vmatprep.mubr.f32.mxu1 %v2549_v0  ;;  %v2279_v27 = vpack.c.bf16 %v1569_v24, %v1568_v9  ;;  %v1531_v9 = vld [vmem:[#allocation8 + $0x58] sm:$0xff] }
  0xa7   :  { %625 = vmatmul.mubr.f32.gmra.mrb[38].mxu0 %v2632_v22  ;;  %2280 = vmatprep.subr.bf16.mxu1 %v2279_v27  ;;  %v2301_v27 = vpack.c.bf16 %v1563_v26, %v1562_v25 }
  0xa8   :  { %786 = vmatmul.mubr.f32.gmra.mrb[38].mxu1 %v2632_v22  ;;  %630 = vmatprep.mubr.f32.mxu0 %v2549_v0  ;;  %v2247_v22 = vpack.c.bf16 %v1537_v59, %v1536_v46  ;;  %v1579_v46 = vld [vmem:[#allocation8 + $0x1d8] sm:$0xff]  ;;  %v1530_v59 = vld [vmem:[#allocation8 + $0x50] sm:$0xff] }
  0xa9   :  { %791 = vmatprep.mubr.f32.mxu1 %v2549_v0  ;;  %2282 = vmatpush3.bf16.msra.mxu1 %v2281_v31  ;;  %v2269_v24 = vpack.c.bf16 %v1531_v9, %v1530_v59 }
  0xaa   :  { %2248 = vmatprep.subr.bf16.mxu0 %v2247_v22  ;;  %2284 = vmatprep.subr.bf16.mxu1 %v2283_v39  ;;  %v2305_v39 = vpack.c.bf16 %v1565_v38, %v1564_v37 }
  0xab   :  { %631 = vmatmul.mubr.f32.gmra.mrb[40].mxu0 %v2638_v35 }
  0xac   :  { %792 = vmatmul.mubr.f32.gmra.mrb[40].mxu1 %v2638_v35  ;;  %636 = vmatprep.mubr.f32.mxu0 %v2549_v0  ;;  %v2251_v35 = vpack.c.bf16 %v1539_v33, %v1538_v32  ;;  %v1581_v32 = vld [vmem:[#allocation8 + $0x1e8] sm:$0xff]  ;;  %v1532_v33 = vld [vmem:[#allocation8 + $0x60] sm:$0xff] }
  0xad   :  { %797 = vmatprep.mubr.f32.mxu1 %v2549_v0  ;;  %2250 = vmatpush3.bf16.msra.mxu0 %v2249_v28  ;;  %v1548_v28 = vld [vmem:[#allocation8 + $0xe0] sm:$0xff]  ;;  %v2273_v36 = vpack.c.bf16 %v1533_v34, %v1532_v33 }
  0xae   :  { %2252 = vmatprep.subr.bf16.mxu0 %v2251_v35  ;;  %2286 = vmatpush3.bf16.msra.mxu1 %v2285_v43  ;;  %v2271_v31 = vpack.c.bf16 %v1549_v29, %v1548_v28  ;;  %v2303_v35 = vpack.c.bf16 %v1581_v32, %v1580_v30 }
  0xaf   :  { %637 = vmatmul.mubr.f32.gmra.mrb[42].mxu0 %v2644_v49 }
  0xb0   :  { %798 = vmatmul.mubr.f32.gmra.mrb[42].mxu1 %v2644_v49  ;;  %642 = vmatprep.mubr.f32.mxu0 %v2549_v0  ;;  %v1573_v49 = vld [vmem:[#allocation8 + $0x1a8] sm:$0xff] }
  0xb1   :  { %803 = vmatprep.mubr.f32.mxu1 %v2549_v0  ;;  %2254 = vmatpush3.bf16.msra.mxu0 %v2253_v40  ;;  %v2287_v52 = vpack.c.bf16 %v1573_v49, %v1572_v47  ;;  %v1550_v40 = vld [vmem:[#allocation8 + $0xf0] sm:$0xff]  ;;  %v1535_v47 = vld [vmem:[#allocation8 + $0x78] sm:$0xff] }
  0xb2   :  { %2256 = vmatprep.subr.bf16.mxu0 %v2255_v48  ;;  %v2275_v43 = vpack.c.bf16 %v1551_v41, %v1550_v40  ;;  %v2307_v48 = vpack.c.bf16 %v1583_v44, %v1582_v42  ;;  %v2277_v49 = vpack.c.bf16 %v1535_v47, %v1534_v45 }
  0xb3   :  { %643 = vmatmul.mubr.f32.gmra.mrb[44].mxu0 %v2650_v63  ;;  %2288 = vmatprep.subr.bf16.mxu1 %v2287_v52  ;;  %v2309_v52 = vpack.c.bf16 %v1567_v51, %v1566_v50 }
  0xb4   :  { %804 = vmatmul.mubr.f32.gmra.mrb[44].mxu1 %v2650_v63  ;;  %648 = vmatprep.mubr.f32.mxu0 %v2549_v0  ;;  %v1526_v63 = vld [vmem:[#allocation8 + $0x30] sm:$0xff] }
  0xb5   :  { %809 = vmatprep.mubr.f32.mxu1 %v2549_v0  ;;  %2258 = vmatpush3.bf16.msra.mxu0 %v2257_v53  ;;  %v2261_v3 = vpack.c.bf16 %v1527_v1, %v1526_v63 }
  0xb6   :  { %2290 = vmatpush3.bf16.msra.mxu1 %v2289_v56  ;;  %2260 = vmatprep.subr.bf16.mxu0 %v2259_v61 }
  0xb7   :  { %649 = vmatmul.mubr.f32.gmra.mrb[46].mxu0 %v2656_v12  ;;  %2292 = vmatprep.subr.bf16.mxu1 %v2291_v2 }
  0xb8   :  { %810 = vmatmul.mubr.f32.gmra.mrb[46].mxu1 %v2656_v12  ;;  %654 = vmatprep.mubr.f32.mxu0 %v2549_v0  ;;  %v1577_v12 = vld [vmem:[#allocation8 + $0x1c8] sm:$0xff] }
  0xb9   :  { %815 = vmatprep.mubr.f32.mxu1 %v2549_v0  ;;  %2262 = vmatpush3.bf16.msra.mxu0 %v2261_v3 }
  0xba   :  { %2294 = vmatpush3.bf16.msra.mxu1 %v2293_v6  ;;  %2264 = vmatprep.subr.bf16.mxu0 %v2263_v11 }
  0xbb   :  { %655 = vmatmul.mubr.f32.gmra.mrb[48].mxu0 %v2662_v15 }
  0xbc   :  { %816 = vmatmul.mubr.f32.gmra.mrb[48].mxu1 %v2662_v15  ;;  %660 = vmatprep.mubr.f32.mxu0 %v2549_v0  ;;  %v2295_v15 = vpack.c.bf16 %v1577_v12, %v1576_v10 }
  0xbd   :  { %821 = vmatprep.mubr.f32.mxu1 %v2549_v0 }
  0xbe   :  { %2296 = vmatprep.subr.bf16.mxu1 %v2295_v15 }
  0xbf   :  { %661 = vmatmul.mubr.f32.gmra.mrb[50].mxu0 %v2668_v16 }
  0xc0   :  { %822 = vmatmul.mubr.f32.gmra.mrb[50].mxu1 %v2668_v16  ;;  %666 = vmatprep.mubr.f32.mxu0 %v2549_v0  ;;  %v2265_v16 = vpack.c.bf16 %v1529_v14, %v1528_v13 }
  0xc1   :  { %827 = vmatprep.mubr.f32.mxu1 %v2549_v0 }
  0xc2   :  { %2266 = vmatpush3.bf16.msra.mxu0 %v2265_v16 }
  0xc3   :  { %667 = vmatmul.mubr.f32.gmra.mrb[52].mxu0 %v2674_v17 }
  0xc4   :  { %828 = vmatmul.mubr.f32.gmra.mrb[52].mxu1 %v2674_v17  ;;  %672 = vmatprep.mubr.f32.mxu0 %v2549_v0  ;;  %v1560_v17 = vld [vmem:[#allocation8 + $0x140] sm:$0xff] }
  0xc5   :  { %833 = vmatprep.mubr.f32.mxu1 %v2549_v0 }
  0xc7   :  { %673 = vmatmul.mubr.f32.gmra.mrb[54].mxu0 %v2680_v18 }
  0xc8   :  { %834 = vmatmul.mubr.f32.gmra.mrb[54].mxu1 %v2680_v18  ;;  %678 = vmatprep.mubr.f32.mxu0 %v2549_v0  ;;  %v1561_v18 = vld [vmem:[#allocation8 + $0x148] sm:$0xff] }
  0xc9   :  { %839 = vmatprep.mubr.f32.mxu1 %v2549_v0 }
  0xcb   :  { %679 = vmatmul.mubr.f32.gmra.mrb[56].mxu0 %v2686_v19 }
  0xcc   :  { %840 = vmatmul.mubr.f32.gmra.mrb[56].mxu1 %v2686_v19  ;;  %684 = vmatprep.mubr.f32.mxu0 %v2549_v0  ;;  %v1546_v19 = vld [vmem:[#allocation8 + $0xd0] sm:$0xff] }
  0xcd   :  { %845 = vmatprep.mubr.f32.mxu1 %v2549_v0 }
  0xcf   :  { %685 = vmatmul.mubr.f32.gmra.mrb[58].mxu0 %v2692_v20 }
  0xd0   :  { %846 = vmatmul.mubr.f32.gmra.mrb[58].mxu1 %v2692_v20  ;;  %690 = vmatprep.mubr.f32.mxu0 %v2549_v0  ;;  %v1547_v20 = vld [vmem:[#allocation8 + $0xd8] sm:$0xff] }
  0xd1   :  { %851 = vmatprep.mubr.f32.mxu1 %v2549_v0 }
  0xd3   :  { %691 = vmatmul.mubr.f32.gmra.mrb[60].mxu0 %v2698_v21 }
  0xd4   :  { %852 = vmatmul.mubr.f32.gmra.mrb[60].mxu1 %v2698_v21  ;;  %696 = vmatprep.mubr.f32.mxu0 %v2549_v0  ;;  %v1578_v21 = vld [vmem:[#allocation8 + $0x1d0] sm:$0xff] }
  0xd5   :  { %857 = vmatprep.mubr.f32.mxu1 %v2549_v0  ;;  %v2297_v0 = vpack.c.bf16 %v1561_v18, %v1560_v17  ;;  %v2299_v22 = vpack.c.bf16 %v1579_v46, %v1578_v21 }
  0xd7   :  { %697 = vmatmul.mubr.f32.gmra.mrb[62].mxu0 %v2704_v23  ;;  %2298 = vmatpush3.bf16.msra.mxu1 %v2297_v0 }
  0xd8   :  { %858 = vmatmul.mubr.f32.gmra.mrb[62].mxu1 %v2704_v23  ;;  %v2267_v23 = vpack.c.bf16 %v1547_v20, %v1546_v19  ;;  %2300 = vmatprep.subr.bf16.mxu1 %v2299_v22 }
  0xda   :  { %2268 = vmatprep.subr.bf16.mxu0 %v2267_v23 }
  0xdb   :  { %2270 = vmatpush3.bf16.msra.mxu0 %v2269_v24  ;;  %2302 = vmatpush3.bf16.msra.mxu1 %v2301_v27 }
  0xdc   :  { %2272 = vmatprep.subr.bf16.mxu0 %v2271_v31  ;;  %2304 = vmatprep.subr.bf16.mxu1 %v2303_v35 }
  0xdf   :  { %2274 = vmatpush3.bf16.msra.mxu0 %v2273_v36  ;;  %2306 = vmatpush3.bf16.msra.mxu1 %v2305_v39 }
  0xe0   :  { %2276 = vmatprep.subr.bf16.mxu0 %v2275_v43  ;;  %2308 = vmatprep.subr.bf16.mxu1 %v2307_v48 }
  0xe3   :  { %2278 = vmatpush3.bf16.msra.mxu0 %v2277_v49  ;;  %2310 = vmatpush3.bf16.msra.mxu1 %v2309_v52 }
 0x12e   :  { %v286_v53 = vpop.f32.mrb[0].mxu0 }
 0x12f   :  { %v928_v54 = vmul.f32 0.044715, %v286_v53  ;;  %v447_v55 = vpop.f32.mrb[0].mxu1  ;;  %v288_v56 = vpop.f32.mrb[1].mxu0  ;;  %v2784_v14 = vmul.f32 0.5, %v286_v53 }
 0x130   :  { %v930_v57 = vmul.f32 0.044715, %v447_v55  ;;  %v929_v58 = vmul.f32 0.044715, %v288_v56  ;;  %v449_v60 = vpop.f32.mrb[1].mxu1  ;;  %v2789_v18 = vmul.f32 0.5, %v447_v55 }
 0x131   :  { %v992_v61 = vmul.f32 %v928_v54, %v286_v53  ;;  %v931_v62 = vmul.f32 0.044715, %v449_v60  ;;  %v2791_v19 = vmul.f32 0.5, %v288_v56  ;;  %v2803_v26 = vmul.f32 0.5, %v449_v60 }
 0x132   :  { %v994_v63 = vmul.f32 %v930_v57, %v447_v55  ;;  %v993_v1 = vmul.f32 %v929_v58, %v288_v56  ;;  %v2773_v2 = vpop.f32.mrb[2].mxu0 }
 0x133   :  { %v1056_v3 = vmul.f32 %v992_v61, %v286_v53  ;;  %v995_v4 = vmul.f32 %v931_v62, %v449_v60  ;;  %v932_v5 = vmul.f32 0.044715, %v2773_v2  ;;  %v2776_v6 = vpop.f32.mrb[2].mxu1  ;;  %v2778_v7 = vpop.f32.mrb[3].mxu0  ;;  %v2808_v30 = vmul.f32 0.5, %v2773_v2 }
 0x134   :  { %v1058_v8 = vmul.f32 %v994_v63, %v447_v55  ;;  %v934_v10 = vmul.f32 0.044715, %v2776_v6  ;;  %v2781_v11 = vpop.f32.mrb[3].mxu1  ;;  %v1057_v12 = vmul.f32 %v993_v1, %v288_v56  ;;  %v933_v13 = vmul.f32 0.044715, %v2778_v7 }
 0x135   :  { %v1120_v15 = vadd.f32 %v1056_v3, %v286_v53  ;;  %v935_v16 = vmul.f32 0.044715, %v2781_v11  ;;  %v1059_v20 = vmul.f32 %v995_v4, %v449_v60  ;;  %v996_v21 = vmul.f32 %v932_v5, %v2773_v2 }
 0x136   :  { %v2787_v17 = vpop.f32.mrb[4].mxu0  ;;  %v1122_v0 = vadd.f32 %v1058_v8, %v447_v55  ;;  %v998_v23 = vmul.f32 %v934_v10, %v2776_v6  ;;  %v997_v27 = vmul.f32 %v933_v13, %v2778_v7  ;;  %v1121_v29 = vadd.f32 %v1057_v12, %v288_v56 }
 0x137   :  { %v2795_v46 = vpop.f32.mrb[4].mxu1  ;;  %v2797_v59 = vpop.f32.mrb[5].mxu0  ;;  %v1184_v9 = vmul.f32 0.7978846, %v1120_v15  ;;  %v936_v22 = vmul.f32 0.044715, %v2787_v17  ;;  %v999_v31 = vmul.f32 %v935_v16, %v2781_v11  ;;  %v1060_v35 = vmul.f32 %v996_v21, %v2773_v2 }
 0x138   :  { %v938_v24 = vmul.f32 0.044715, %v2795_v46  ;;  %v2801_v25 = vpop.f32.mrb[5].mxu1  ;;  %v937_v28 = vmul.f32 0.044715, %v2797_v59  ;;  %v1062_v36 = vmul.f32 %v998_v23, %v2776_v6  ;;  %v1123_v40 = vadd.f32 %v1059_v20, %v449_v60 }
 0x139   :  { %v939_v32 = vmul.f32 0.044715, %v2801_v25  ;;  %2320 = vtanh.f32 %v1184_v9  ;;  %v1186_v34 = vmul.f32 0.7978846, %v1122_v0  ;;  %v1000_v41 = vmul.f32 %v936_v22, %v2787_v17 }
 0x13a   :  { %v2812_v33 = vpop.f32.mrb[6].mxu0  ;;  %v1002_v42 = vmul.f32 %v938_v24, %v2795_v46  ;;  %v1001_v47 = vmul.f32 %v937_v28, %v2797_v59  ;;  %v1185_v49 = vmul.f32 0.7978846, %v1121_v29  ;;  %v2830_v50 = vmul.f32 %v997_v27, %v2778_v7 }
 0x13b   :  { %v940_v37 = vmul.f32 0.044715, %v2812_v33  ;;  %v2817_v38 = vpop.f32.mrb[6].mxu1  ;;  %v2819_v39 = vpop.f32.mrb[7].mxu0  ;;  %2322 = vtanh.f32 %v1186_v34  ;;  %v2833_v51 = vmul.f32 %v999_v31, %v2781_v11  ;;  %v1003_v52 = vmul.f32 %v939_v32, %v2801_v25 }
 0x13c   :  { %v942_v43 = vmul.f32 0.044715, %v2817_v38  ;;  %v941_v44 = vmul.f32 0.044715, %v2819_v39  ;;  %v2825_v45 = vpop.f32.mrb[7].mxu1  ;;  %v2847_v62 = vmul.f32 %v1000_v41, %v2787_v17  ;;  %v2850_v63 = vmul.f32 %v1002_v42, %v2795_v46 }
 0x13d   :  { %v943_v48 = vmul.f32 0.044715, %v2825_v45  ;;  %v1004_v53 = vmul.f32 %v940_v37, %v2812_v33  ;;  %v1187_v61 = vmul.f32 0.7978846, %v1123_v40  ;;  %v2857_v5 = vmul.f32 %v1001_v47, %v2797_v59 }
 0x13e   :  { %v2837_v54 = vpop.f32.mrb[8].mxu0  ;;  %v1006_v55 = vmul.f32 %v942_v43, %v2817_v38  ;;  %v1005_v56 = vmul.f32 %v941_v44, %v2819_v39  ;;  %2324 = vtanh.f32 %v1185_v49  ;;  %v1124_v10 = vadd.f32 %v1060_v35, %v2773_v2 }
 0x13f   :  { %v944_v57 = vmul.f32 0.044715, %v2837_v54  ;;  %v2842_v58 = vpop.f32.mrb[8].mxu1  ;;  %v2844_v60 = vpop.f32.mrb[9].mxu0  ;;  %v1007_v8 = vmul.f32 %v943_v48, %v2825_v45  ;;  %v2862_v12 = vmul.f32 %v1003_v52, %v2801_v25  ;;  %v2865_v13 = vmul.f32 %v1004_v53, %v2812_v33 }
 0x140   :  { %v946_v1 = vmul.f32 0.044715, %v2842_v58  ;;  %v945_v3 = vmul.f32 0.044715, %v2844_v60  ;;  %v2854_v4 = vpop.f32.mrb[9].mxu1  ;;  %v2872_v20 = vmul.f32 %v1006_v55, %v2817_v38  ;;  %v2875_v21 = vmul.f32 %v1005_v56, %v2819_v39 }
 0x141   :  { %v1008_v15 = vmul.f32 %v944_v57, %v2837_v54  ;;  %v947_v16 = vmul.f32 0.044715, %v2854_v4  ;;  %2326 = vtanh.f32 %v1187_v61  ;;  %v2889_v32 = vmul.f32 %v1007_v8, %v2825_v45 }
 0x142   :  { %v2869_v0 = vpop.f32.mrb[10].mxu0  ;;  %v1010_v24 = vmul.f32 %v946_v1, %v2842_v58  ;;  %v1009_v27 = vmul.f32 %v945_v3, %v2844_v60  ;;  %v1188_v35 = vmul.f32 0.7978846, %v1124_v10  ;;  %v1126_v37 = vadd.f32 %v1062_v36, %v2776_v6 }
 0x143   :  { %3680 = vst [vmem:[#allocation13_spill] sm:$0xff] %v2869_v0  ;;  %v948_v2 = vmul.f32 0.044715, %v2869_v0  ;;  %v2878_v23 = vpop.f32.mrb[10].mxu1  ;;  %v2880_v9 = vpop.f32.mrb[11].mxu0  ;;  %v2894_v40 = vmul.f32 %v1008_v15, %v2837_v54  ;;  %v1011_v41 = vmul.f32 %v947_v16, %v2854_v4  ;;  %v2901_v44 = vmul.f32 0.5, %v2776_v6 }
 0x144   :  { %3681 = vst [vmem:[#allocation14_spill] sm:$0xff] %v2878_v23  ;;  %3682 = vst [vmem:[#allocation15_spill] sm:$0xff] %v2880_v9  ;;  %v2321_v22 = vpop.eup %2320  ;;  %v950_v28 = vmul.f32 0.044715, %v2878_v23  ;;  %v949_v29 = vmul.f32 0.044715, %v2880_v9  ;;  %v2911_v56 = vmul.f32 %v1010_v24, %v2842_v58  ;;  %v2914_v57 = vmul.f32 %v1009_v27, %v2844_v60 }
 0x145   :  { %v2886_v31 = vpop.f32.mrb[11].mxu1  ;;  %v1012_v42 = vmul.f32 %v948_v2, %v2869_v0  ;;  %v2323_v47 = vpop.eup %2322  ;;  %v1312_v55 = vadd.f32 1.0, %v2321_v22  ;;  %2328 = vtanh.f32 %v1188_v35  ;;  %v1190_v10 = vmul.f32 0.7978846, %v1126_v37 }
 0x146   :  { %3683 = vst [vmem:[#allocation16_spill] sm:$0xff] %v2886_v31  ;;  %v951_v34 = vmul.f32 0.044715, %v2886_v31  ;;  %v2898_v43 = vpop.f32.mrb[12].mxu0  ;;  %v1014_v48 = vmul.f32 %v950_v28, %v2878_v23  ;;  %v1013_v49 = vmul.f32 %v949_v29, %v2880_v9  ;;  %v2923_v15 = vmul.f32 %v1011_v41, %v2854_v4 }
 0x147   :  { %3684 = vst [vmem:[#allocation17_spill] sm:$0xff] %v2898_v43  ;;  %v952_v52 = vmul.f32 0.044715, %v2898_v43  ;;  %v2906_v36 = vpop.f32.mrb[12].mxu1  ;;  %v2908_v53 = vpop.f32.mrb[13].mxu0  ;;  %v2926_v16 = vmul.f32 %v1012_v42, %v2869_v0  ;;  %v1314_v24 = vadd.f32 1.0, %v2323_v47  ;;  %v2943_v41 = vmul.f32 %v1312_v55, %v2784_v14 }
 0x148   :  { %3685 = vst [vmem:[#allocation18_spill] sm:$0xff] %v2906_v36  ;;  %3686 = vst [vmem:[#allocation19_spill] sm:$0xff] %v2908_v53  ;;  %v954_v6 = vmul.f32 0.044715, %v2906_v36  ;;  %v953_v61 = vmul.f32 0.044715, %v2908_v53  ;;  %v1015_v3 = vmul.f32 %v951_v34, %v2886_v31  ;;  %v2325_v27 = vpop.eup %2324  ;;  %v2932_v28 = vmul.f32 %v1014_v48, %v2878_v23 }
 0x149   :  { %v2918_v1 = vpop.f32.mrb[13].mxu1  ;;  %3688 = vst [vmem:[#allocation21_spill] sm:$0xff] %v2926_v16  ;;  %v1016_v2 = vmul.f32 %v952_v52, %v2898_v43  ;;  %v2935_v29 = vmul.f32 %v1013_v49, %v2880_v9  ;;  %2330 = vtanh.f32 %v1190_v10  ;;  %v1313_v16 = vadd.f32 1.0, %v2325_v27 }
 0x14a   :  { %3687 = vst [vmem:[#allocation20_spill] sm:$0xff] %v2918_v1  ;;  %v955_v8 = vmul.f32 0.044715, %v2918_v1  ;;  %v2929_v22 = vpop.f32.mrb[14].mxu0  ;;  %3690 = vst [vmem:[#allocation23_spill] sm:$0xff] %v2932_v28  ;;  %v1018_v42 = vmul.f32 %v954_v6, %v2906_v36  ;;  %v1017_v47 = vmul.f32 %v953_v61, %v2908_v53  ;;  %v2963_v61 = vmul.f32 %v1314_v24, %v2789_v18 }
 0x14b   :  { %3689 = vst [vmem:[#allocation22_spill] sm:$0xff] %v2929_v22  ;;  %3691 = vst [vmem:[#allocation24_spill] sm:$0xff] %v2935_v29  ;;  %v956_v34 = vmul.f32 0.044715, %v2929_v22  ;;  %v2938_v35 = vpop.f32.mrb[14].mxu1  ;;  %v2940_v37 = vpop.f32.mrb[15].mxu0  ;;  %v2952_v29 = vmul.f32 %v1015_v3, %v2886_v31  ;;  %v2957_v14 = vmul.f32 %v1016_v2, %v2898_v43  ;;  %v1125_v2 = vadd.f32 %v2830_v50, %v2778_v7 }
 0x14c   :  { %3692 = vst [vmem:[#allocation25_spill] sm:$0xff] %v2938_v35  ;;  %3693 = vst [vmem:[#allocation26_spill] sm:$0xff] %v2940_v37  ;;  %v958_v52 = vmul.f32 0.044715, %v2938_v35  ;;  %v957_v48 = vmul.f32 0.044715, %v2940_v37  ;;  %v2327_v49 = vpop.eup %2326  ;;  %v1019_v9 = vmul.f32 %v955_v8, %v2918_v1  ;;  %v2978_v18 = vmul.f32 %v1017_v47, %v2908_v53 }
 0x14d   :  { %v2949_v28 = vpop.f32.mrb[15].mxu1  ;;  %3695 = vst [vmem:[#allocation28_spill] sm:$0xff] %v2952_v29  ;;  %3696 = vst [vmem:[#allocation29_spill] sm:$0xff] %v2957_v14  ;;  %v1020_v55 = vmul.f32 %v956_v34, %v2929_v22  ;;  %v2975_v34 = vmul.f32 %v1018_v42, %v2906_v36  ;;  %v1315_v50 = vadd.f32 1.0, %v2327_v49  ;;  %v2993_v47 = vmul.f32 %v1313_v16, %v2791_v19 }
 0x14e   :  { %3694 = vst [vmem:[#allocation27_spill] sm:$0xff] %v2949_v28  ;;  %v959_v23 = vmul.f32 0.044715, %v2949_v28  ;;  %v2960_v6 = vpop.f32.mrb[16].mxu0  ;;  %v1022_v0 = vmul.f32 %v958_v52, %v2938_v35  ;;  %v1021_v3 = vmul.f32 %v957_v48, %v2940_v37  ;;  %3700 = vst [vmem:[#allocation33_spill] sm:$0xff] %v2978_v18  ;;  %v2985_v48 = vmul.f32 %v1019_v9, %v2918_v1 }
 0x14f   :  { %3697 = vst [vmem:[#allocation30_spill] sm:$0xff] %v2960_v6  ;;  %v960_v8 = vmul.f32 0.044715, %v2960_v6  ;;  %v2968_v29 = vpop.f32.mrb[16].mxu1  ;;  %v2970_v10 = vpop.f32.mrb[17].mxu0  ;;  %3699 = vst [vmem:[#allocation32_spill] sm:$0xff] %v2975_v34  ;;  %v2999_v9 = vmul.f32 %v1020_v55, %v2929_v22 }
 0x150   :  { %3698 = vst [vmem:[#allocation31_spill] sm:$0xff] %v2968_v29  ;;  %v1023_v24 = vmul.f32 %v959_v23, %v2949_v28  ;;  %v962_v27 = vmul.f32 0.044715, %v2968_v29  ;;  %v2982_v52 = vpop.f32.mrb[17].mxu1  ;;  %3701 = vst [vmem:[#allocation34_spill] sm:$0xff] %v2985_v48  ;;  %v2996_v23 = vmul.f32 0.5, %v2778_v7  ;;  %v2329_v53 = vpop.eup %2328  ;;  %v3002_v48 = vmul.f32 %v1022_v0, %v2938_v35 }
 0x151   :  { %v961_v14 = vmul.f32 0.044715, %v2970_v10  ;;  %v963_v43 = vmul.f32 0.044715, %v2982_v52  ;;  %v1024_v42 = vmul.f32 %v960_v8, %v2960_v6  ;;  %v1189_v18 = vmul.f32 0.7978846, %v1125_v2 }
 0x152   :  { %v2990_v34 = vpop.f32.mrb[18].mxu0  ;;  %3703 = vst [vmem:[#allocation36_spill] sm:$0xff] %v2999_v9  ;;  %3704 = vst [vmem:[#allocation37_spill] sm:$0xff] %v3002_v48  ;;  %v3005_v49 = vmul.f32 %v1021_v3, %v2940_v37  ;;  %v3013_v7 = vmul.f32 %v1023_v24, %v2949_v28  ;;  %v1026_v16 = vmul.f32 %v962_v27, %v2968_v29  ;;  %v1316_v27 = vadd.f32 1.0, %v2329_v53 }
 0x153   :  { %3702 = vst [vmem:[#allocation35_spill] sm:$0xff] %v2990_v34  ;;  %v964_v8 = vmul.f32 0.044715, %v2990_v34  ;;  %v3008_v1 = vpop.f32.mrb[18].mxu1  ;;  %v3010_v19 = vpop.f32.mrb[19].mxu0  ;;  %v1025_v3 = vmul.f32 %v961_v14, %v2970_v10  ;;  %v3024_v48 = vmul.f32 %v1315_v50, %v2803_v26  ;;  %v3027_v24 = vmul.f32 %v1024_v42, %v2960_v6 }
 0x154   :  { %3705 = vst [vmem:[#allocation38_spill] sm:$0xff] %v3005_v49  ;;  %3706 = vst [vmem:[#allocation39_spill] sm:$0xff] %v3008_v1  ;;  %v966_v55 = vmul.f32 0.044715, %v3008_v1  ;;  %v965_v2 = vmul.f32 0.044715, %v3010_v19  ;;  %v1027_v49 = vmul.f32 %v963_v43, %v2982_v52  ;;  %2332 = vtanh.f32 %v1189_v18  ;;  %v2331_v35 = vpop.eup %2330 }
 0x155   :  { %3707 = vst [vmem:[#allocation40_spill] sm:$0xff] %v3010_v19  ;;  %3708 = vst [vmem:[#allocation41_spill] sm:$0xff] %v3013_v7  ;;  %v3018_v0 = vpop.f32.mrb[19].mxu1  ;;  %v3032_v28 = vmul.f32 0.5, %v2781_v11  ;;  %v1028_v14 = vmul.f32 %v964_v8, %v2990_v34  ;;  %v1127_v50 = vadd.f32 %v2833_v51, %v2781_v11  ;;  %v3044_v53 = vmul.f32 %v1026_v16, %v2968_v29 }
 0x156   :  { %3709 = vst [vmem:[#allocation42_spill] sm:$0xff] %v3018_v0  ;;  %v967_v37 = vmul.f32 0.044715, %v3018_v0  ;;  %3710 = vst [vmem:[#allocation43_spill] sm:$0xff] %v3027_v24  ;;  %v3029_v7 = vpop.f32.mrb[20].mxu0  ;;  %v1030_v43 = vmul.f32 %v966_v55, %v3008_v1  ;;  %v1029_v18 = vmul.f32 %v965_v2, %v3010_v19  ;;  %v3052_v55 = vmul.f32 %v1025_v3, %v2970_v10 }
 0x157   :  { %3711 = vst [vmem:[#allocation44_spill] sm:$0xff] %v3029_v7  ;;  %v968_v9 = vmul.f32 0.044715, %v3029_v7  ;;  %v3037_v22 = vpop.f32.mrb[20].mxu1  ;;  %v3039_v26 = vpop.f32.mrb[21].mxu0  ;;  %3714 = vst [vmem:[#allocation47_spill] sm:$0xff] %v3044_v53  ;;  %v3055_v6 = vmul.f32 %v1027_v49, %v2982_v52  ;;  %v3063_v2 = vmul.f32 %v1316_v27, %v2808_v30  ;;  %v3066_v31 = vmul.f32 %v1028_v14, %v2990_v34 }
 0x158   :  { %3712 = vst [vmem:[#allocation45_spill] sm:$0xff] %v3037_v22  ;;  %3713 = vst [vmem:[#allocation46_spill] sm:$0xff] %v3039_v26  ;;  %v970_v42 = vmul.f32 0.044715, %v3037_v22  ;;  %v969_v8 = vmul.f32 0.044715, %v3039_v26  ;;  %v1031_v36 = vmul.f32 %v967_v37, %v3018_v0  ;;  %v3069_v3 = vmul.f32 %v1030_v43, %v3008_v1 }
 0x159   :  { %v3049_v24 = vpop.f32.mrb[21].mxu1  ;;  %3716 = vst [vmem:[#allocation49_spill] sm:$0xff] %v3055_v6  ;;  %v1032_v51 = vmul.f32 %v968_v9, %v3029_v7  ;;  %v1318_v53 = vadd.f32 1.0, %v2331_v35  ;;  %v1191_v29 = vmul.f32 0.7978846, %v1127_v50  ;;  %3717 = vst [vmem:[#allocation50_spill] sm:$0xff] %v3066_v31  ;;  %v1128_v9 = vadd.f32 %v2847_v62, %v2787_v17 }
 0x15a   :  { %3715 = vst [vmem:[#allocation48_spill] sm:$0xff] %v3049_v24  ;;  %v971_v11 = vmul.f32 0.044715, %v3049_v24  ;;  %v3060_v16 = vpop.f32.mrb[22].mxu0  ;;  %3718 = vst [vmem:[#allocation51_spill] sm:$0xff] %v3069_v3  ;;  %v1034_v49 = vmul.f32 %v970_v42, %v3037_v22  ;;  %v3079_v30 = vmul.f32 %v1029_v18, %v3010_v19  ;;  %v1033_v35 = vmul.f32 %v969_v8, %v3039_v26 }
 0x15b   :  { %v3072_v37 = vpop.f32.mrb[22].mxu1  ;;  %v3074_v6 = vpop.f32.mrb[23].mxu0  ;;  %v972_v27 = vmul.f32 0.044715, %v3060_v16  ;;  %v3087_v50 = vmul.f32 %v1031_v36, %v3018_v0  ;;  %2334 = vtanh.f32 %v1191_v29  ;;  %v3092_v62 = vmul.f32 %v1032_v51, %v3029_v7 }
 0x15c   :  { %3719 = vst [vmem:[#allocation52_spill] sm:$0xff] %v3072_v37  ;;  %3720 = vst [vmem:[#allocation53_spill] sm:$0xff] %v3074_v6  ;;  %v974_v14 = vmul.f32 0.044715, %v3072_v37  ;;  %v3084_v43 = vpop.f32.mrb[23].mxu1  ;;  %v1035_v42 = vmul.f32 %v971_v11, %v3049_v24  ;;  %v3101_v19 = vmul.f32 0.5, %v2787_v17  ;;  %v3104_v36 = vmul.f32 %v1034_v49, %v3037_v22 }
 0x15d   :  { %3721 = vst [vmem:[#allocation54_spill] sm:$0xff] %v3079_v30  ;;  %3722 = vst [vmem:[#allocation55_spill] sm:$0xff] %v3084_v43  ;;  %v973_v3 = vmul.f32 0.044715, %v3074_v6  ;;  %v975_v18 = vmul.f32 0.044715, %v3084_v43  ;;  %v3098_v30 = vmul.f32 %v1318_v53, %v2901_v44  ;;  %v3114_v44 = vmul.f32 %v1033_v35, %v3039_v26 }
 0x15e   :  { %3723 = vst [vmem:[#allocation56_spill] sm:$0xff] %v3087_v50  ;;  %3724 = vst [vmem:[#allocation57_spill] sm:$0xff] %v3092_v62  ;;  %v3095_v8 = vpop.f32.mrb[24].mxu0  ;;  %v1192_v51 = vmul.f32 0.7978846, %v1128_v9  ;;  %v1130_v62 = vadd.f32 %v2850_v63, %v2795_v46  ;;  %v2333_v7 = vpop.eup %2332  ;;  %v1036_v17 = vmul.f32 %v972_v27, %v3060_v16  ;;  %v1038_v53 = vmul.f32 %v974_v14, %v3072_v37 }
 0x15f   :  { %3725 = vst [vmem:[#allocation58_spill] sm:$0xff] %v3095_v8  ;;  %3726 = vst [vmem:[#allocation59_spill] sm:$0xff] %v3104_v36  ;;  %v976_v11 = vmul.f32 0.044715, %v3095_v8  ;;  %v3107_v50 = vpop.f32.mrb[24].mxu1  ;;  %v3109_v29 = vpop.f32.mrb[25].mxu0  ;;  %v3122_v22 = vmul.f32 %v1035_v42, %v3049_v24  ;;  %v1037_v9 = vmul.f32 %v973_v3, %v3074_v6  ;;  %v1039_v35 = vmul.f32 %v975_v18, %v3084_v43 }
 0x160   :  { %3727 = vst [vmem:[#allocation60_spill] sm:$0xff] %v3107_v50  ;;  %3728 = vst [vmem:[#allocation61_spill] sm:$0xff] %v3114_v44  ;;  %v978_v49 = vmul.f32 0.044715, %v3107_v50  ;;  %v3119_v36 = vpop.f32.mrb[25].mxu1  ;;  %v3127_v63 = vmul.f32 0.5, %v2795_v46  ;;  %2336 = vtanh.f32 %v1192_v51  ;;  %v3141_v46 = vmul.f32 %v1036_v17, %v3060_v16 }
 0x161   :  { %3729 = vst [vmem:[#allocation62_spill] sm:$0xff] %v3119_v36  ;;  %3730 = vst [vmem:[#allocation63_spill] sm:$0xff] %v3122_v22  ;;  %v977_v0 = vmul.f32 0.044715, %v3109_v29  ;;  %v1040_v27 = vmul.f32 %v976_v11, %v3095_v8  ;;  %v979_v14 = vmul.f32 0.044715, %v3119_v36  ;;  %v3144_v18 = vmul.f32 %v1038_v53, %v3072_v37 }
 0x162   :  { %v3132_v44 = vpop.f32.mrb[26].mxu0  ;;  %v1194_v26 = vmul.f32 0.7978846, %v1130_v62  ;;  %v1042_v1 = vmul.f32 %v978_v49, %v3107_v50  ;;  %v1317_v24 = vadd.f32 1.0, %v2333_v7  ;;  %3732 = vst [vmem:[#allocation65_spill] sm:$0xff] %v3141_v46  ;;  %v3151_v49 = vmul.f32 %v1037_v9, %v3074_v6 }
 0x163   :  { %v980_v42 = vmul.f32 0.044715, %v3132_v44  ;;  %v3136_v22 = vpop.f32.mrb[26].mxu1  ;;  %v3138_v3 = vpop.f32.mrb[27].mxu0  ;;  %3733 = vst [vmem:[#allocation66_spill] sm:$0xff] %v3144_v18  ;;  %v1041_v34 = vmul.f32 %v977_v0, %v3109_v29  ;;  %v3156_v51 = vmul.f32 %v1039_v35, %v3084_v43  ;;  %v3159_v17 = vmul.f32 %v1040_v27, %v3095_v8 }
 0x164   :  { %3731 = vst [vmem:[#allocation64_spill] sm:$0xff] %v3138_v3  ;;  %v982_v11 = vmul.f32 0.044715, %v3136_v22  ;;  %v981_v62 = vmul.f32 0.044715, %v3138_v3  ;;  %v3148_v31 = vpop.f32.mrb[27].mxu1  ;;  %2338 = vtanh.f32 %v1194_v26  ;;  %v1043_v53 = vmul.f32 %v979_v14, %v3119_v36 }
 0x165   :  { %3734 = vst [vmem:[#allocation67_spill] sm:$0xff] %v3151_v49  ;;  %v983_v7 = vmul.f32 0.044715, %v3148_v31  ;;  %3735 = vst [vmem:[#allocation68_spill] sm:$0xff] %v3156_v51  ;;  %v1129_v37 = vadd.f32 %v2857_v5, %v2797_v59  ;;  %v2335_v9 = vpop.eup %2334  ;;  %v3167_v49 = vmul.f32 %v1042_v1, %v3107_v50  ;;  %v1044_v0 = vmul.f32 %v980_v42, %v3132_v44 }
 0x166   :  { %3736 = vst [vmem:[#allocation69_spill] sm:$0xff] %v3159_v17  ;;  %v3162_v18 = vpop.f32.mrb[28].mxu0  ;;  %v3176_v27 = vmul.f32 %v1317_v24, %v2996_v23  ;;  %v1046_v14 = vmul.f32 %v982_v11, %v3136_v22  ;;  %v1045_v17 = vmul.f32 %v981_v62, %v3138_v3  ;;  %v3185_v42 = vmul.f32 %v1041_v34, %v3109_v29 }
 0x167   :  { %3737 = vst [vmem:[#allocation70_spill] sm:$0xff] %v3162_v18  ;;  %3738 = vst [vmem:[#allocation71_spill] sm:$0xff] %v3167_v49  ;;  %v984_v26 = vmul.f32 0.044715, %v3162_v18  ;;  %v3171_v35 = vpop.f32.mrb[28].mxu1  ;;  %v3173_v51 = vpop.f32.mrb[29].mxu0  ;;  %v1047_v50 = vmul.f32 %v983_v7, %v3148_v31  ;;  %v3191_v24 = vmul.f32 %v1043_v53, %v3119_v36  ;;  %v1131_v6 = vadd.f32 %v2862_v12, %v2801_v25 }
 0x168   :  { %v986_v5 = vmul.f32 0.044715, %v3171_v35  ;;  %v985_v1 = vmul.f32 0.044715, %v3173_v51  ;;  %v3182_v49 = vpop.f32.mrb[29].mxu1  ;;  %3739 = vst [vmem:[#allocation72_spill] sm:$0xff] %v3185_v42  ;;  %v3214_v12 = vmul.f32 %v1045_v17, %v3138_v3 }
 0x169   :  { %v1048_v8 = vmul.f32 %v984_v26, %v3162_v18  ;;  %v987_v23 = vmul.f32 0.044715, %v3182_v49  ;;  %3740 = vst [vmem:[#allocation73_spill] sm:$0xff] %v3191_v24  ;;  %v1319_v62 = vadd.f32 1.0, %v2335_v9  ;;  %v1193_v43 = vmul.f32 0.7978846, %v1129_v37 }
 0x16a   :  { %v3193_v11 = vpop.f32.mrb[30].mxu0  ;;  %v1050_v46 = vmul.f32 %v986_v5, %v3171_v35  ;;  %v1049_v34 = vmul.f32 %v985_v1, %v3173_v51  ;;  %v3205_v53 = vmul.f32 0.5, %v2797_v59  ;;  %v3208_v24 = vmul.f32 %v1044_v0, %v3132_v44  ;;  %3746 = vst [vmem:[#allocation79_spill] sm:$0xff] %v3214_v12  ;;  %v2337_v1 = vpop.eup %2336 }
 0x16b   :  { %3741 = vst [vmem:[#allocation74_spill] sm:$0xff] %v3193_v11  ;;  %v988_v7 = vmul.f32 0.044715, %v3193_v11  ;;  %v3200_v42 = vpop.f32.mrb[30].mxu1  ;;  %v3202_v26 = vpop.f32.mrb[31].mxu0  ;;  %v3211_v37 = vmul.f32 %v1046_v14, %v3136_v22  ;;  %v1051_v9 = vmul.f32 %v987_v23, %v3182_v49  ;;  %v3220_v36 = vmul.f32 %v1047_v50, %v3148_v31 }
 0x16c   :  { %3742 = vst [vmem:[#allocation75_spill] sm:$0xff] %v3200_v42  ;;  %3743 = vst [vmem:[#allocation76_spill] sm:$0xff] %v3202_v26  ;;  %v3217_v5 = vpop.f32.mrb[31].mxu1  ;;  %v3223_v59 = vmul.f32 %v1048_v8, %v3162_v18  ;;  %v990_v0 = vmul.f32 0.044715, %v3200_v42  ;;  %v1383_v17 = vmul.f32 %v1319_v62, %v3032_v28  ;;  %2340 = vtanh.f32 %v1193_v43 }
 0x16d   :  { %3744 = vst [vmem:[#allocation77_spill] sm:$0xff] %v3208_v24  ;;  %3745 = vst [vmem:[#allocation78_spill] sm:$0xff] %v3211_v37  ;;  %v989_v24 = vmul.f32 0.044715, %v3202_v26  ;;  %v1052_v14 = vmul.f32 %v988_v7, %v3193_v11  ;;  %v1195_v23 = vmul.f32 0.7978846, %v1131_v6  ;;  %v3230_v3 = vmul.f32 %v1050_v46, %v3171_v35 }
 0x16e   :  { %3747 = vst [vmem:[#allocation80_spill] sm:$0xff] %v3220_v36  ;;  %3748 = vst [vmem:[#allocation81_spill] sm:$0xff] %v3223_v59  ;;  %v608_v37 = vpop.f32.mrb[32].mxu0  ;;  %v2339_v12 = vpop.eup %2338  ;;  %v3233_v50 = vmul.f32 %v1049_v34, %v3173_v51  ;;  %v991_v8 = vmul.f32 0.044715, %v3217_v5  ;;  %v3238_v7 = vmul.f32 %v1051_v9, %v3182_v49  ;;  %v1320_v62 = vadd.f32 1.0, %v2337_v1 }
 0x16f   :  { %v1440_v59 = vmul.f32 %v2943_v41, %v608_v37  ;;  %v769_v18 = vpop.f32.mrb[32].mxu1  ;;  %v610_v36 = vpop.f32.mrb[33].mxu0  ;;  %v1054_v46 = vmul.f32 %v990_v0, %v3200_v42  ;;  %v3244_v34 = vmul.f32 %v989_v24, %v3202_v26  ;;  %2342 = vtanh.f32 %v1195_v23 }
 0x170   :  { %3749 = vst [vmem:[#allocation82_spill] sm:$0xff] %v3233_v50  ;;  %3750 = vst [vmem:[#allocation83_spill] sm:$0xff] %v3238_v7  ;;  %v1442_v28 = vmul.f32 %v2963_v61, %v769_v18  ;;  %v1441_v6 = vmul.f32 %v2993_v47, %v610_v36  ;;  %v771_v43 = vpop.f32.mrb[33].mxu1  ;;  %v3248_v41 = vmul.f32 %v1052_v14, %v3193_v11  ;;  %v1322_v9 = vadd.f32 1.0, %v2339_v12  ;;  %v3801_v7 = vld [vmem:[#allocation63_spill] sm:$0xff] }
 0x171   :  { %v1443_v50 = vmul.f32 %v3024_v48, %v771_v43  ;;  %v1132_v61 = vadd.f32 %v2865_v13, %v2812_v33  ;;  %v1134_v47 = vadd.f32 %v2872_v20, %v2817_v38  ;;  %v3255_v36 = vmul.f32 %v991_v8, %v3217_v5 }
 0x172   :  { %3751 = vst [vmem:[#allocation84_spill] sm:$0xff] %v3248_v41  ;;  %v614_v37 = vpop.f32.mrb[34].mxu0  ;;  %1648 = vmatprep.mubr.f32.mxu0 %v1441_v6  ;;  %v875_v1 = vmul.f32 0.5, %v2801_v25  ;;  %v1133_v12 = vadd.f32 %v2875_v21, %v2819_v39  ;;  %v3267_v25 = vmul.f32 %v1054_v46, %v3200_v42  ;;  %v1386_v21 = vmul.f32 %v1322_v9, %v3127_v63 }
 0x173   :  { %v1444_v18 = vmul.f32 %v3063_v2, %v614_v37  ;;  %v775_v24 = vpop.f32.mrb[34].mxu1  ;;  %1793 = vmatprep.mubr.f32.mxu1 %v1443_v50  ;;  %v616_v48 = vpop.f32.mrb[35].mxu0  ;;  %1649 = vmatmul.mubr.f32.vlgmr.msra.gmra.mrb[64].mxu0 %v1440_v59  ;;  %v1196_v20 = vmul.f32 0.7978846, %v1132_v61  ;;  %v1198_v23 = vmul.f32 0.7978846, %v1134_v47  ;;  %v1384_v2 = vmul.f32 %v1320_v62, %v3101_v19 }
 0x174   :  { %v1446_v0 = vmul.f32 %v3098_v30, %v775_v24  ;;  %v1445_v13 = vmul.f32 %v3176_v27, %v616_v48  ;;  %v777_v14 = vpop.f32.mrb[35].mxu1  ;;  %1794 = vmatmul.mubr.f32.vlgmr.msra.gmra.mrb[64].mxu1 %v1442_v28  ;;  %v1197_v6 = vmul.f32 0.7978846, %v1133_v12  ;;  %v1135_v59 = vadd.f32 %v2889_v32, %v2825_v45  ;;  %3752 = vst [vmem:[#allocation85_spill] sm:$0xff] %v3267_v25 }
 0x175   :  { %v1447_v8 = vmul.f32 %v1383_v17, %v777_v14  ;;  %2344 = vtanh.f32 %v1196_v20  ;;  %v1136_v30 = vadd.f32 %v2894_v40, %v2837_v54  ;;  %v1138_v32 = vadd.f32 %v2911_v56, %v2842_v58  ;;  %v3754_v14 = vld [vmem:[#allocation21_spill] sm:$0xff] }
 0x176   :  { %v620_v50 = vpop.f32.mrb[36].mxu0  ;;  %1653 = vmatprep.mubr.f32.mxu0 %v1445_v13  ;;  %2346 = vtanh.f32 %v1198_v23  ;;  %v1199_v19 = vmul.f32 0.7978846, %v1135_v59  ;;  %v2341_v43 = vpop.eup %2340  ;;  %v876_v63 = vmul.f32 0.5, %v2812_v33  ;;  %v1137_v61 = vadd.f32 %v2914_v57, %v2844_v60  ;;  %v3753_v13 = vld [vmem:[#allocation13_spill] sm:$0xff] }
 0x177   :  { %v1448_v27 = vmul.f32 %v1384_v2, %v620_v50  ;;  %v781_v28 = vpop.f32.mrb[36].mxu1  ;;  %1798 = vmatprep.mubr.f32.mxu1 %v1447_v8  ;;  %v622_v17 = vpop.f32.mrb[37].mxu0  ;;  %1654 = vmatmul.mubr.f32.gmra.mrb[66].mxu0 %v1444_v18  ;;  %2348 = vtanh.f32 %v1197_v6  ;;  %v1200_v37 = vmul.f32 0.7978846, %v1136_v30  ;;  %v1321_v40 = vadd.f32 1.0, %v2341_v43  ;;  %v3755_v2 = vld [vmem:[#allocation14_spill] sm:$0xff] }
 0x178   :  { %v3274_v62 = vmul.f32 %v1386_v21, %v781_v28  ;;  %v783_v46 = vpop.f32.mrb[37].mxu1  ;;  %1799 = vmatmul.mubr.f32.gmra.mrb[66].mxu1 %v1446_v0  ;;  %2350 = vtanh.f32 %v1199_v19  ;;  %v1202_v9 = vmul.f32 0.7978846, %v1138_v32  ;;  %v878_v18 = vmul.f32 0.5, %v2817_v38  ;;  %v3757_v19 = vld [vmem:[#allocation15_spill] sm:$0xff]  ;;  %v3758_v32 = vld [vmem:[#allocation24_spill] sm:$0xff] }
 0x179   :  { %v3283_v56 = vmul.f32 0.5, %v2819_v39  ;;  %2352 = vtanh.f32 %v1200_v37  ;;  %v1139_v24 = vadd.f32 %v2923_v15, %v2854_v4  ;;  %v2343_v33 = vpop.eup %2342  ;;  %v1385_v48 = vmul.f32 %v1321_v40, %v3205_v53  ;;  %v3756_v15 = vld [vmem:[#allocation23_spill] sm:$0xff] }
 0x17a   :  { %v3279_v47 = vpop.f32.mrb[38].mxu0  ;;  %2354 = vtanh.f32 %v1202_v9  ;;  %v1201_v57 = vmul.f32 0.7978846, %v1137_v61  ;;  %v1140_v20 = vadd.f32 %v3754_v14, %v3753_v13  ;;  %v1323_v38 = vadd.f32 1.0, %v2343_v33  ;;  %v3762_v14 = vld [vmem:[#allocation29_spill] sm:$0xff] }
 0x17b   :  { %v3288_v12 = vpop.f32.mrb[38].mxu1  ;;  %v3290_v0 = vpop.f32.mrb[39].mxu0  ;;  %v879_v39 = vmul.f32 0.5, %v2825_v45  ;;  %v1203_v8 = vmul.f32 0.7978846, %v1139_v24  ;;  %v1142_v6 = vadd.f32 %v3756_v15, %v3755_v2  ;;  %v1449_v59 = vmul.f32 %v1385_v48, %v622_v17  ;;  %v3763_v15 = vld [vmem:[#allocation18_spill] sm:$0xff] }
 0x17c   :  { %v3294_v23 = vpop.f32.mrb[39].mxu1  ;;  %v880_v53 = vmul.f32 0.5, %v2837_v54  ;;  %2356 = vtanh.f32 %v1201_v57  ;;  %v1204_v50 = vmul.f32 0.7978846, %v1140_v20  ;;  %v1387_v21 = vmul.f32 %v1323_v38, %v875_v1  ;;  %v3759_v54 = vld [vmem:[#allocation16_spill] sm:$0xff]  ;;  %v3761_v57 = vld [vmem:[#allocation17_spill] sm:$0xff] }
 0x17d   :  { %2358 = vtanh.f32 %v1203_v8  ;;  %v1206_v28 = vmul.f32 0.7978846, %v1142_v6  ;;  %v1141_v43 = vadd.f32 %v3758_v32, %v3757_v19  ;;  %1658 = vmatprep.mubr.f32.mxu0 %v1449_v59  ;;  %v882_v45 = vmul.f32 0.5, %v2842_v58  ;;  %v3760_v1 = vld [vmem:[#allocation28_spill] sm:$0xff] }
 0x17e   :  { %v3300_v30 = vpop.f32.mrb[40].mxu0  ;;  %v3310_v17 = vmul.f32 0.5, %v2844_v60  ;;  %2360 = vtanh.f32 %v1204_v50  ;;  %v1143_v9 = vadd.f32 %v3760_v1, %v3759_v54  ;;  %v1451_v24 = vmul.f32 %v1387_v21, %v783_v46  ;;  %1659 = vmatmul.mubr.f32.gmra.mrb[68].mxu0 %v1448_v27  ;;  %v3764_v6 = vld [vmem:[#allocation32_spill] sm:$0xff] }
 0x17f   :  { %v3304_v37 = vpop.f32.mrb[40].mxu1  ;;  %v3307_v40 = vpop.f32.mrb[41].mxu0  ;;  %2362 = vtanh.f32 %v1206_v28  ;;  %v1205_v48 = vmul.f32 0.7978846, %v1141_v43  ;;  %v1144_v20 = vadd.f32 %v3762_v14, %v3761_v57  ;;  %v883_v8 = vmul.f32 0.5, %v2854_v4 }
 0x180   :  { %v2345_v61 = vpop.eup %2344  ;;  %v3314_v33 = vpop.f32.mrb[41].mxu1  ;;  %v1207_v60 = vmul.f32 0.7978846, %v1143_v9  ;;  %v1146_v59 = vadd.f32 %v3764_v6, %v3763_v15  ;;  %1803 = vmatprep.mubr.f32.mxu1 %v1451_v24  ;;  %v3324_v27 = vmul.f32 0.5, %v3753_v13  ;;  %v3765_v13 = vld [vmem:[#allocation19_spill] sm:$0xff] }
 0x181   :  { %v2347_v58 = vpop.eup %2346  ;;  %v1324_v38 = vadd.f32 1.0, %v2345_v61  ;;  %2364 = vtanh.f32 %v1205_v48  ;;  %v1208_v21 = vmul.f32 0.7978846, %v1144_v20  ;;  %1804 = vmatmul.mubr.f32.gmra.mrb[68].mxu1 %v3274_v62  ;;  %v3766_v48 = vld [vmem:[#allocation33_spill] sm:$0xff] }
 0x182   :  { %v2349_v50 = vpop.eup %2348  ;;  %v1326_v32 = vadd.f32 1.0, %v2347_v58  ;;  %v3321_v46 = vpop.f32.mrb[42].mxu0  ;;  %2366 = vtanh.f32 %v1207_v60  ;;  %v1210_v61 = vmul.f32 0.7978846, %v1146_v59  ;;  %v1145_v20 = vadd.f32 %v3766_v48, %v3765_v13 }
 0x183   :  { %v2351_v28 = vpop.eup %2350  ;;  %v1388_v43 = vmul.f32 %v1324_v38, %v876_v63  ;;  %v1325_v1 = vadd.f32 1.0, %v2349_v50  ;;  %v3327_v4 = vpop.f32.mrb[42].mxu1  ;;  %2368 = vtanh.f32 %v1208_v21  ;;  %v886_v48 = vmul.f32 0.5, %v3755_v2 }
 0x184   :  { %v3329_v9 = vpop.f32.mrb[43].mxu0  ;;  %v2353_v14 = vpop.eup %2352  ;;  %v1390_v24 = vmul.f32 %v1326_v32, %v878_v18  ;;  %v1327_v58 = vadd.f32 1.0, %v2351_v28  ;;  %2370 = vtanh.f32 %v1210_v61  ;;  %v1209_v18 = vmul.f32 0.7978846, %v1145_v20 }
 0x185   :  { %v3331_v6 = vpop.f32.mrb[43].mxu1  ;;  %v2355_v25 = vpop.eup %2354  ;;  %v1452_v63 = vmul.f32 %v1388_v43, %v3279_v47  ;;  %v1389_v62 = vmul.f32 %v1325_v1, %v3283_v56  ;;  %v1328_v38 = vadd.f32 1.0, %v2353_v14  ;;  %v3767_v56 = vld [vmem:[#allocation20_spill] sm:$0xff]  ;;  %v3768_v43 = vld [vmem:[#allocation34_spill] sm:$0xff] }
 0x186   :  { %v1454_v50 = vmul.f32 %v1390_v24, %v3288_v12  ;;  %v1391_v60 = vmul.f32 %v1327_v58, %v879_v39  ;;  %v1330_v59 = vadd.f32 1.0, %v2355_v25  ;;  %v3338_v42 = vpop.f32.mrb[44].mxu0  ;;  %v2357_v32 = vpop.eup %2356  ;;  %v1147_v1 = vadd.f32 %v3768_v43, %v3767_v56 }
 0x187   :  { %v1453_v21 = vmul.f32 %v1389_v62, %v3290_v0  ;;  %v1392_v28 = vmul.f32 %v1328_v38, %v880_v53  ;;  %v3342_v41 = vpop.f32.mrb[44].mxu1  ;;  %v3344_v47 = vpop.f32.mrb[45].mxu0  ;;  %v1329_v39 = vadd.f32 1.0, %v2357_v32  ;;  %2372 = vtanh.f32 %v1209_v18 }
 0x188   :  { %v2359_v61 = vpop.eup %2358  ;;  %v1455_v12 = vmul.f32 %v1391_v60, %v3294_v23  ;;  %v1394_v25 = vmul.f32 %v1330_v59, %v882_v45  ;;  %v3349_v14 = vpop.f32.mrb[45].mxu1  ;;  %v885_v53 = vmul.f32 0.5, %v3757_v19  ;;  %v1211_v58 = vmul.f32 0.7978846, %v1147_v1  ;;  %v3769_v60 = vld [vmem:[#allocation22_spill] sm:$0xff]  ;;  %v3770_v59 = vld [vmem:[#allocation36_spill] sm:$0xff] }
 0x189   :  { %v2361_v24 = vpop.eup %2360  ;;  %v1456_v0 = vmul.f32 %v1392_v28, %v3300_v30  ;;  %1663 = vmatprep.mubr.f32.mxu0 %v1453_v21  ;;  %v1331_v2 = vadd.f32 1.0, %v2359_v61  ;;  %v1393_v38 = vmul.f32 %v1329_v39, %v3310_v17  ;;  %v1148_v18 = vadd.f32 %v3770_v59, %v3769_v60  ;;  %v3771_v1 = vld [vmem:[#allocation25_spill] sm:$0xff] }
 0x18a   :  { %v2363_v20 = vpop.eup %2362  ;;  %v1458_v62 = vmul.f32 %v1394_v25, %v3304_v37  ;;  %1808 = vmatprep.mubr.f32.mxu1 %v1455_v12  ;;  %1664 = vmatmul.mubr.f32.gmra.mrb[70].mxu0 %v1452_v63  ;;  %v1332_v23 = vadd.f32 1.0, %v2361_v24  ;;  %v3355_v45 = vpop.f32.mrb[46].mxu0  ;;  %v887_v21 = vmul.f32 0.5, %v3759_v54  ;;  %2374 = vtanh.f32 %v1211_v58  ;;  %v3772_v61 = vld [vmem:[#allocation37_spill] sm:$0xff] }
 0x18b   :  { %v1395_v32 = vmul.f32 %v1331_v2, %v883_v8  ;;  %1809 = vmatmul.mubr.f32.gmra.mrb[70].mxu1 %v1454_v50  ;;  %v1334_v30 = vadd.f32 1.0, %v2363_v20  ;;  %v3360_v19 = vpop.f32.mrb[46].mxu1  ;;  %v3362_v28 = vpop.f32.mrb[47].mxu0  ;;  %v1457_v17 = vmul.f32 %v1393_v38, %v3307_v40  ;;  %v1212_v43 = vmul.f32 0.7978846, %v1148_v18  ;;  %v3774_v18 = vld [vmem:[#allocation38_spill] sm:$0xff] }
 0x18c   :  { %v2365_v37 = vpop.eup %2364  ;;  %v1396_v63 = vmul.f32 %v1332_v23, %v3324_v27  ;;  %v1150_v12 = vadd.f32 %v3772_v61, %v3771_v1  ;;  %v3368_v25 = vpop.f32.mrb[47].mxu1  ;;  %v888_v24 = vmul.f32 0.5, %v3761_v57  ;;  %v3776_v61 = vld [vmem:[#allocation41_spill] sm:$0xff] }
 0x18d   :  { %v2367_v8 = vpop.eup %2366  ;;  %v1459_v50 = vmul.f32 %v1395_v32, %v3314_v33  ;;  %v1398_v54 = vmul.f32 %v1334_v30, %v886_v48  ;;  %v1333_v39 = vadd.f32 1.0, %v2365_v37  ;;  %1668 = vmatprep.mubr.f32.mxu0 %v1457_v17  ;;  %2376 = vtanh.f32 %v1212_v43  ;;  %v3773_v48 = vld [vmem:[#allocation26_spill] sm:$0xff]  ;;  %v3775_v43 = vld [vmem:[#allocation27_spill] sm:$0xff] }
 0x18e   :  { %v2369_v2 = vpop.eup %2368  ;;  %v1460_v58 = vmul.f32 %v1396_v63, %v3321_v46  ;;  %v1335_v40 = vadd.f32 1.0, %v2367_v8  ;;  %v1214_v27 = vmul.f32 0.7978846, %v1150_v12  ;;  %v3373_v20 = vpop.f32.mrb[48].mxu0  ;;  %1669 = vmatmul.mubr.f32.gmra.mrb[72].mxu0 %v1456_v0  ;;  %v1149_v32 = vadd.f32 %v3774_v18, %v3773_v48  ;;  %v3781_v18 = vld [vmem:[#allocation47_spill] sm:$0xff] }
 0x18f   :  { %v2371_v38 = vpop.eup %2370  ;;  %v1462_v23 = vmul.f32 %v1398_v54, %v3327_v4  ;;  %1813 = vmatprep.mubr.f32.mxu1 %v1459_v50  ;;  %v1397_v59 = vmul.f32 %v1333_v39, %v885_v53  ;;  %v1336_v33 = vadd.f32 1.0, %v2369_v2  ;;  %v3378_v57 = vpop.f32.mrb[48].mxu1  ;;  %v890_v37 = vmul.f32 0.5, %v3763_v15  ;;  %v3778_v39 = vld [vmem:[#allocation43_spill] sm:$0xff] }
 0x190   :  { %v3380_v30 = vpop.f32.mrb[49].mxu0  ;;  %v1399_v46 = vmul.f32 %v1335_v40, %v887_v21  ;;  %1814 = vmatmul.mubr.f32.gmra.mrb[72].mxu1 %v1458_v62  ;;  %v1338_v17 = vadd.f32 1.0, %v2371_v38  ;;  %2378 = vtanh.f32 %v1214_v27  ;;  %v3383_v63 = vpop.f32.mrb[49].mxu1  ;;  %v1213_v0 = vmul.f32 0.7978846, %v1149_v32  ;;  %v3777_v62 = vld [vmem:[#allocation30_spill] sm:$0xff] }
 0x191   :  { %v1461_v4 = vmul.f32 %v1397_v59, %v3329_v9  ;;  %v1400_v53 = vmul.f32 %v1336_v33, %v888_v24  ;;  %v1151_v12 = vadd.f32 %v3776_v61, %v3775_v43  ;;  %v2373_v8 = vpop.eup %2372  ;;  %v889_v21 = vmul.f32 0.5, %v3765_v13  ;;  %v3780_v33 = vld [vmem:[#allocation31_spill] sm:$0xff] }
 0x192   :  { %v1463_v50 = vmul.f32 %v1399_v46, %v3331_v6  ;;  %v1402_v54 = vmul.f32 %v1338_v17, %v890_v37  ;;  %v1152_v15 = vadd.f32 %v3778_v39, %v3777_v62  ;;  %v3392_v2 = vpop.f32.mrb[50].mxu0  ;;  %v1337_v9 = vadd.f32 1.0, %v2373_v8  ;;  %v3782_v8 = vld [vmem:[#allocation49_spill] sm:$0xff]  ;;  %v3784_v39 = vld [vmem:[#allocation50_spill] sm:$0xff] }
 0x193   :  { %v1464_v40 = vmul.f32 %v1400_v53, %v3338_v42  ;;  %1673 = vmatprep.mubr.f32.mxu0 %v1461_v4  ;;  %2380 = vtanh.f32 %v1213_v0  ;;  %v1215_v24 = vmul.f32 0.7978846, %v1151_v12  ;;  %v3395_v27 = vpop.f32.mrb[50].mxu1  ;;  %v3397_v38 = vpop.f32.mrb[51].mxu0  ;;  %v3401_v6 = vmul.f32 %v3244_v34, %v3202_v26 }
 0x194   :  { %v1466_v13 = vmul.f32 %v1402_v54, %v3342_v41  ;;  %1818 = vmatprep.mubr.f32.mxu1 %v1463_v50  ;;  %1674 = vmatmul.mubr.f32.gmra.mrb[74].mxu0 %v1460_v58  ;;  %v1216_v59 = vmul.f32 0.7978846, %v1152_v15  ;;  %v1154_v42 = vadd.f32 %v3781_v18, %v3780_v33  ;;  %v3406_v32 = vpop.f32.mrb[51].mxu1  ;;  %v2375_v46 = vpop.eup %2374  ;;  %v1401_v37 = vmul.f32 %v1337_v9, %v889_v21  ;;  %v3783_v21 = vld [vmem:[#allocation35_spill] sm:$0xff] }
 0x195   :  { %3779 = vst [vmem:[#allocation13_spill] sm:$0xff] %v3401_v6  ;;  %v891_v17 = vmul.f32 0.5, %v3767_v56  ;;  %1819 = vmatmul.mubr.f32.gmra.mrb[74].mxu1 %v1462_v23  ;;  %2382 = vtanh.f32 %v1215_v24  ;;  %v1153_v34 = vadd.f32 %v3052_v55, %v2970_v10  ;;  %v1339_v4 = vadd.f32 1.0, %v2375_v46  ;;  %v3785_v24 = vld [vmem:[#allocation39_spill] sm:$0xff] }
 0x196   :  { %v892_v41 = vmul.f32 0.5, %v3769_v60  ;;  %2384 = vtanh.f32 %v1216_v59  ;;  %v1218_v58 = vmul.f32 0.7978846, %v1154_v42  ;;  %v3412_v53 = vpop.f32.mrb[52].mxu0  ;;  %v1465_v0 = vmul.f32 %v1401_v37, %v3344_v47  ;;  %v3786_v59 = vld [vmem:[#allocation51_spill] sm:$0xff] }
 0x197   :  { %v894_v61 = vmul.f32 0.5, %v3771_v1  ;;  %v1217_v12 = vmul.f32 0.7978846, %v1153_v34  ;;  %v1155_v56 = vadd.f32 %v3782_v8, %v2982_v52  ;;  %v3418_v23 = vpop.f32.mrb[52].mxu1  ;;  %v3420_v50 = vpop.f32.mrb[53].mxu0  ;;  %v1403_v54 = vmul.f32 %v1339_v4, %v891_v17  ;;  %v3787_v17 = vld [vmem:[#allocation40_spill] sm:$0xff] }
 0x198   :  { %v2377_v55 = vpop.eup %2376  ;;  %v893_v60 = vmul.f32 0.5, %v3773_v48  ;;  %2386 = vtanh.f32 %v1218_v58  ;;  %v1156_v15 = vadd.f32 %v3784_v39, %v3783_v21  ;;  %v3425_v9 = vpop.f32.mrb[53].mxu1  ;;  %1678 = vmatprep.mubr.f32.mxu0 %v1465_v0  ;;  %v1158_v18 = vadd.f32 %v3786_v59, %v3785_v24  ;;  %v3788_v34 = vld [vmem:[#allocation54_spill] sm:$0xff] }
 0x199   :  { %v1340_v47 = vadd.f32 1.0, %v2377_v55  ;;  %2388 = vtanh.f32 %v1217_v12  ;;  %v1219_v1 = vmul.f32 0.7978846, %v1155_v56  ;;  %v1467_v46 = vmul.f32 %v1403_v54, %v3349_v14  ;;  %1679 = vmatmul.mubr.f32.gmra.mrb[76].mxu0 %v1464_v40  ;;  %v3789_v40 = vld [vmem:[#allocation42_spill] sm:$0xff]  ;;  %v3790_v54 = vld [vmem:[#allocation56_spill] sm:$0xff] }
 0x19a   :  { %v2379_v42 = vpop.eup %2378  ;;  %v895_v37 = vmul.f32 0.5, %v3775_v43  ;;  %v1220_v48 = vmul.f32 0.7978846, %v1156_v15  ;;  %v1157_v4 = vadd.f32 %v3788_v34, %v3787_v17  ;;  %v3433_v58 = vpop.f32.mrb[54].mxu0  ;;  %v1222_v0 = vmul.f32 0.7978846, %v1158_v18 }
 0x19b   :  { %v1404_v8 = vmul.f32 %v1340_v47, %v892_v41  ;;  %v1342_v55 = vadd.f32 1.0, %v2379_v42  ;;  %2390 = vtanh.f32 %v1219_v1  ;;  %v3435_v12 = vpop.f32.mrb[54].mxu1  ;;  %v3437_v56 = vpop.f32.mrb[55].mxu0  ;;  %1823 = vmatprep.mubr.f32.mxu1 %v1467_v46  ;;  %v896_v14 = vmul.f32 0.5, %v3777_v62  ;;  %v3791_v46 = vld [vmem:[#allocation44_spill] sm:$0xff]  ;;  %v3792_v62 = vld [vmem:[#allocation57_spill] sm:$0xff] }
 0x19c   :  { %2392 = vtanh.f32 %v1220_v48  ;;  %v1221_v43 = vmul.f32 0.7978846, %v1157_v4  ;;  %v1159_v39 = vadd.f32 %v3790_v54, %v3789_v40  ;;  %v3442_v15 = vpop.f32.mrb[55].mxu1  ;;  %1824 = vmatmul.mubr.f32.gmra.mrb[76].mxu1 %v1466_v13  ;;  %v898_v1 = vmul.f32 0.5, %v3780_v33  ;;  %v3795_v13 = vld [vmem:[#allocation59_spill] sm:$0xff] }
 0x19d   :  { %v2381_v59 = vpop.eup %2380  ;;  %v1468_v41 = vmul.f32 %v1404_v8, %v3355_v45  ;;  %v1406_v47 = vmul.f32 %v1342_v55, %v894_v61  ;;  %2394 = vtanh.f32 %v1222_v0  ;;  %v1160_v48 = vadd.f32 %v3792_v62, %v3791_v46  ;;  %v3794_v61 = vld [vmem:[#allocation45_spill] sm:$0xff] }
 0x19e   :  { %v1341_v18 = vadd.f32 1.0, %v2381_v59  ;;  %2396 = vtanh.f32 %v1221_v43  ;;  %v1223_v42 = vmul.f32 0.7978846, %v1159_v39  ;;  %v3448_v34 = vpop.f32.mrb[56].mxu0  ;;  %v897_v6 = vmul.f32 0.5, %v2970_v10 }
 0x19f   :  { %3793 = vst [vmem:[#allocation21_spill] sm:$0xff] %v3448_v34  ;;  %v2383_v4 = vpop.eup %2382  ;;  %v1470_v54 = vmul.f32 %v1406_v47, %v3360_v19  ;;  %v899_v45 = vmul.f32 0.5, %v2982_v52  ;;  %v1162_v8 = vadd.f32 %v3795_v13, %v3794_v61  ;;  %v3455_v33 = vpop.f32.mrb[56].mxu1  ;;  %v1224_v59 = vmul.f32 0.7978846, %v1160_v48  ;;  %v3798_v47 = vld [vmem:[#allocation46_spill] sm:$0xff] }
 0x1a0   :  { %3796 = vst [vmem:[#allocation14_spill] sm:$0xff] %v3455_v33  ;;  %v3457_v55 = vpop.f32.mrb[57].mxu0  ;;  %v2385_v0 = vpop.eup %2384  ;;  %v1405_v43 = vmul.f32 %v1341_v18, %v893_v60  ;;  %v1343_v39 = vadd.f32 1.0, %v2383_v4  ;;  %2398 = vtanh.f32 %v1223_v42  ;;  %v900_v19 = vmul.f32 0.5, %v3783_v21  ;;  %v3799_v52 = vld [vmem:[#allocation61_spill] sm:$0xff] }
 0x1a1   :  { %3797 = vst [vmem:[#allocation23_spill] sm:$0xff] %v3457_v55  ;;  %v3459_v62 = vpop.f32.mrb[57].mxu1  ;;  %v1344_v26 = vadd.f32 1.0, %v2385_v0  ;;  %v1226_v10 = vmul.f32 0.7978846, %v1162_v8  ;;  %v1161_v11 = vadd.f32 %v3799_v52, %v3798_v47  ;;  %2400 = vtanh.f32 %v1224_v59  ;;  %v3800_v55 = vld [vmem:[#allocation48_spill] sm:$0xff] }
 0x1a2   :  { %v2387_v34 = vpop.eup %2386  ;;  %v1469_v13 = vmul.f32 %v1405_v43, %v3362_v28  ;;  %v1407_v33 = vmul.f32 %v1343_v39, %v895_v37  ;;  %v1163_v60 = vadd.f32 %v3801_v7, %v3800_v55  ;;  %v3467_v18 = vpop.f32.mrb[58].mxu0  ;;  %v902_v37 = vmul.f32 0.5, %v3785_v24 }
 0x1a3   :  { %v2389_v42 = vpop.eup %2388  ;;  %v1408_v48 = vmul.f32 %v1344_v26, %v896_v14  ;;  %v1346_v4 = vadd.f32 1.0, %v2387_v34  ;;  %2402 = vtanh.f32 %v1226_v10  ;;  %v1225_v0 = vmul.f32 0.7978846, %v1161_v11  ;;  %v3469_v21 = vpop.f32.mrb[58].mxu1  ;;  %v3802_v11 = vld [vmem:[#allocation65_spill] sm:$0xff] }
 0x1a4   :  { %v3471_v8 = vpop.f32.mrb[59].mxu0  ;;  %v1471_v52 = vmul.f32 %v1407_v33, %v3368_v25  ;;  %1683 = vmatprep.mubr.f32.mxu0 %v1469_v13  ;;  %v1345_v28 = vadd.f32 1.0, %v2389_v42  ;;  %v1227_v43 = vmul.f32 0.7978846, %v1163_v60  ;;  %v3475_v39 = vpop.f32.mrb[59].mxu1  ;;  %v1164_v14 = vadd.f32 %v3802_v11, %v3060_v16  ;;  %v3804_v42 = vld [vmem:[#allocation66_spill] sm:$0xff] }
 0x1a5   :  { %v2391_v7 = vpop.eup %2390  ;;  %v1472_v59 = vmul.f32 %v1408_v48, %v3373_v20  ;;  %v1410_v26 = vmul.f32 %v1346_v4, %v898_v1  ;;  %1684 = vmatmul.mubr.f32.gmra.mrb[78].mxu0 %v1468_v41  ;;  %2404 = vtanh.f32 %v1225_v0  ;;  %v901_v33 = vmul.f32 0.5, %v3787_v17  ;;  %v3803_v41 = vld [vmem:[#allocation52_spill] sm:$0xff] }
 0x1a6   :  { %v2393_v34 = vpop.eup %2392  ;;  %1828 = vmatprep.mubr.f32.mxu1 %v1471_v52  ;;  %v1409_v10 = vmul.f32 %v1345_v28, %v897_v6  ;;  %v1347_v25 = vadd.f32 1.0, %v2391_v7  ;;  %2406 = vtanh.f32 %v1227_v43  ;;  %v3481_v24 = vpop.f32.mrb[60].mxu0  ;;  %v1228_v1 = vmul.f32 0.7978846, %v1164_v14 }
 0x1a7   :  { %v2395_v13 = vpop.eup %2394  ;;  %v1474_v60 = vmul.f32 %v1410_v26, %v3378_v57  ;;  %1829 = vmatmul.mubr.f32.gmra.mrb[78].mxu1 %v1470_v54  ;;  %v1348_v20 = vadd.f32 1.0, %v2393_v34  ;;  %v1166_v48 = vadd.f32 %v3804_v42, %v3803_v41  ;;  %v3486_v4 = vpop.f32.mrb[60].mxu1  ;;  %v903_v43 = vmul.f32 0.5, %v3789_v40 }
 0x1a8   :  { %3805 = vst [vmem:[#allocation15_spill] sm:$0xff] %v3486_v4  ;;  %v3488_v0 = vpop.f32.mrb[61].mxu0  ;;  %v2397_v6 = vpop.eup %2396  ;;  %v1473_v52 = vmul.f32 %v1409_v10, %v3380_v30  ;;  %v1411_v17 = vmul.f32 %v1347_v25, %v899_v45  ;;  %v1350_v28 = vadd.f32 1.0, %v2395_v13  ;;  %2408 = vtanh.f32 %v1228_v1  ;;  %v3808_v4 = vld [vmem:[#allocation67_spill] sm:$0xff] }
 0x1a9   :  { %3806 = vst [vmem:[#allocation24_spill] sm:$0xff] %v3488_v0  ;;  %v3492_v7 = vpop.f32.mrb[61].mxu1  ;;  %v1412_v57 = vmul.f32 %v1348_v20, %v900_v19  ;;  %v1349_v54 = vadd.f32 1.0, %v2397_v6  ;;  %v1230_v26 = vmul.f32 0.7978846, %v1166_v48  ;;  %v904_v42 = vmul.f32 0.5, %v3791_v46 }
 0x1aa   :  { %v2399_v11 = vpop.eup %2398  ;;  %v1475_v14 = vmul.f32 %v1411_v17, %v3383_v63  ;;  %v1414_v34 = vmul.f32 %v1350_v28, %v902_v37  ;;  %1688 = vmatprep.mubr.f32.mxu0 %v1473_v52  ;;  %v3807_v0 = vld [vmem:[#allocation53_spill] sm:$0xff]  ;;  %v3498_v45 = vpop.f32.mrb[62].mxu0  ;;  %v906_v46 = vmul.f32 0.5, %v3794_v61  ;;  %v3809_v1 = vld [vmem:[#allocation55_spill] sm:$0xff]  ;;  %v3810_v48 = vld [vmem:[#allocation68_spill] sm:$0xff] }
 0x1ab   :  { %v1165_v30 = vadd.f32 %v3808_v4, %v3807_v0  ;;  %v1476_v40 = vmul.f32 %v1412_v57, %v3392_v2  ;;  %v1413_v10 = vmul.f32 %v1349_v54, %v901_v33  ;;  %v1351_v25 = vadd.f32 1.0, %v2399_v11  ;;  %1689 = vmatmul.mubr.f32.gmra.mrb[80].mxu0 %v1472_v59  ;;  %v3501_v19 = vpop.f32.mrb[62].mxu1  ;;  %v3503_v13 = vpop.f32.mrb[63].mxu0  ;;  %v3811_v17 = vld [vmem:[#allocation58_spill] sm:$0xff]  ;;  %v3812_v28 = vld [vmem:[#allocation69_spill] sm:$0xff] }
 0x1ac   :  { %2410 = vtanh.f32 %v1230_v26  ;;  %v2401_v63 = vpop.eup %2400  ;;  %v1478_v37 = vmul.f32 %v1414_v34, %v3395_v27  ;;  %1833 = vmatprep.mubr.f32.mxu1 %v1475_v14  ;;  %v1167_v4 = vadd.f32 %v3810_v48, %v3809_v1  ;;  %v3509_v6 = vpop.f32.mrb[63].mxu1  ;;  %v1168_v57 = vadd.f32 %v3812_v28, %v3811_v17  ;;  %v3814_v48 = vld [vmem:[#allocation71_spill] sm:$0xff] }
 0x1ad   :  { %v1229_v20 = vmul.f32 0.7978846, %v1165_v30  ;;  %v2403_v2 = vpop.eup %2402  ;;  %v1477_v59 = vmul.f32 %v1413_v10, %v3397_v38  ;;  %v1415_v33 = vmul.f32 %v1351_v25, %v903_v43  ;;  %1834 = vmatmul.mubr.f32.gmra.mrb[80].mxu1 %v1474_v60  ;;  %v1352_v52 = vadd.f32 1.0, %v2401_v63  ;;  %v3813_v30 = vld [vmem:[#allocation60_spill] sm:$0xff] }
 0x1ae   :  { %v1354_v54 = vadd.f32 1.0, %v2403_v2  ;;  %v905_v27 = vmul.f32 0.5, %v3798_v47  ;;  %v1231_v61 = vmul.f32 0.7978846, %v1167_v4  ;;  %v1232_v34 = vmul.f32 0.7978846, %v1168_v57 }
 0x1af   :  { %2412 = vtanh.f32 %v1229_v20  ;;  %v2405_v26 = vpop.eup %2404  ;;  %v1479_v11 = vmul.f32 %v1415_v33, %v3406_v32  ;;  %v1416_v14 = vmul.f32 %v1352_v52, %v904_v42  ;;  %1693 = vmatprep.mubr.f32.mxu0 %v1477_v59  ;;  %v1170_v38 = vadd.f32 %v3814_v48, %v3813_v30  ;;  %v3817_v33 = vld [vmem:[#allocation73_spill] sm:$0xff] }
 0x1b0   :  { %v2407_v43 = vpop.eup %2406  ;;  %v1418_v60 = vmul.f32 %v1354_v54, %v906_v46  ;;  %v1353_v10 = vadd.f32 1.0, %v2405_v26  ;;  %v907_v25 = vmul.f32 0.5, %v3800_v55  ;;  %1694 = vmatmul.mubr.f32.gmra.mrb[82].mxu0 %v1476_v40  ;;  %2414 = vtanh.f32 %v1231_v61  ;;  %v3815_v46 = vld [vmem:[#allocation72_spill] sm:$0xff]  ;;  %v3818_v54 = vld [vmem:[#allocation77_spill] sm:$0xff] }
 0x1b1   :  { %v1480_v47 = vmul.f32 %v1416_v14, %v3412_v53  ;;  %1838 = vmatprep.mubr.f32.mxu1 %v1479_v11  ;;  %v1355_v63 = vadd.f32 1.0, %v2407_v43  ;;  %2416 = vtanh.f32 %v1232_v34  ;;  %v1234_v20 = vmul.f32 0.7978846, %v1170_v38  ;;  %v3816_v53 = vld [vmem:[#allocation62_spill] sm:$0xff]  ;;  %v3820_v43 = vld [vmem:[#allocation64_spill] sm:$0xff] }
 0x1b2   :  { %v3522_v32 = vmul.f32 %v3255_v36, %v3217_v5  ;;  %v1482_v42 = vmul.f32 %v1418_v60, %v3418_v23  ;;  %v1417_v4 = vmul.f32 %v1353_v10, %v905_v27  ;;  %1839 = vmatmul.mubr.f32.gmra.mrb[82].mxu1 %v1478_v37  ;;  %v1169_v2 = vadd.f32 %v3815_v46, %v3109_v29  ;;  %v2409_v55 = vpop.eup %2408  ;;  %v3819_v11 = vld [vmem:[#allocation78_spill] sm:$0xff]  ;;  %v3821_v60 = vld [vmem:[#allocation79_spill] sm:$0xff]  ;;  %v3822_v46 = vld [vmem:[#allocation80_spill] sm:$0xff] }
 0x1b3   :  { %v1419_v40 = vmul.f32 %v1355_v63, %v907_v25  ;;  %v908_v59 = vmul.f32 0.5, %v3060_v16  ;;  %2418 = vtanh.f32 %v1234_v20  ;;  %v1171_v52 = vadd.f32 %v3817_v33, %v3816_v53 }
 0x1b4   :  { %v1481_v28 = vmul.f32 %v1417_v4, %v3420_v50  ;;  %v1356_v57 = vadd.f32 1.0, %v2409_v55  ;;  %v1233_v36 = vmul.f32 0.7978846, %v1169_v2  ;;  %v1172_v23 = vadd.f32 %v3818_v54, %v3132_v44 }
 0x1b5   :  { %v1483_v37 = vmul.f32 %v1419_v40, %v3425_v9  ;;  %v910_v61 = vmul.f32 0.5, %v3803_v41  ;;  %v1235_v26 = vmul.f32 0.7978846, %v1171_v52  ;;  %v1174_v16 = vadd.f32 %v3819_v11, %v3136_v22 }
 0x1b6   :  { %v2411_v27 = vpop.eup %2410  ;;  %v1420_v14 = vmul.f32 %v1356_v57, %v908_v59  ;;  %1698 = vmatprep.mubr.f32.mxu0 %v1481_v28  ;;  %2420 = vtanh.f32 %v1233_v36  ;;  %v1236_v48 = vmul.f32 0.7978846, %v1172_v23  ;;  %v909_v50 = vmul.f32 0.5, %v3807_v0  ;;  %v3823_v59 = vld [vmem:[#allocation70_spill] sm:$0xff] }
 0x1b7   :  { %v1358_v34 = vadd.f32 1.0, %v2411_v27  ;;  %1843 = vmatprep.mubr.f32.mxu1 %v1483_v37  ;;  %1699 = vmatmul.mubr.f32.gmra.mrb[84].mxu0 %v1480_v47  ;;  %2422 = vtanh.f32 %v1235_v26  ;;  %v1238_v38 = vmul.f32 0.7978846, %v1174_v16  ;;  %v1173_v9 = vadd.f32 %v3821_v60, %v3820_v43 }
 0x1b8   :  { %v1484_v41 = vmul.f32 %v1420_v14, %v3433_v58  ;;  %v911_v63 = vmul.f32 0.5, %v3809_v1  ;;  %1844 = vmatmul.mubr.f32.gmra.mrb[84].mxu1 %v1482_v42  ;;  %2424 = vtanh.f32 %v1236_v48  ;;  %v1175_v0 = vadd.f32 %v3822_v46, %v3148_v31  ;;  %v3824_v58 = vld [vmem:[#allocation81_spill] sm:$0xff] }
 0x1b9   :  { %v2413_v10 = vpop.eup %2412  ;;  %v1422_v25 = vmul.f32 %v1358_v34, %v910_v61  ;;  %2426 = vtanh.f32 %v1238_v38  ;;  %v1237_v4 = vmul.f32 0.7978846, %v1173_v9  ;;  %v912_v55 = vmul.f32 0.5, %v3811_v17 }
 0x1ba   :  { %v1357_v20 = vadd.f32 1.0, %v2413_v10  ;;  %v2415_v47 = vpop.eup %2414  ;;  %v914_v40 = vmul.f32 0.5, %v3813_v30  ;;  %v1176_v33 = vadd.f32 %v3824_v58, %v3823_v59  ;;  %v1239_v28 = vmul.f32 0.7978846, %v1175_v0  ;;  %v3825_v30 = vld [vmem:[#allocation82_spill] sm:$0xff] }
 0x1bb   :  { %v1486_v2 = vmul.f32 %v1422_v25, %v3435_v12  ;;  %v2417_v52 = vpop.eup %2416  ;;  %v1359_v42 = vadd.f32 1.0, %v2415_v47  ;;  %2428 = vtanh.f32 %v1237_v4  ;;  %v913_v36 = vmul.f32 0.5, %v3109_v29  ;;  %v3828_v25 = vld [vmem:[#allocation74_spill] sm:$0xff] }
 0x1bc   :  { %v1421_v1 = vmul.f32 %v1357_v20, %v909_v50  ;;  %v1360_v57 = vadd.f32 1.0, %v2417_v52  ;;  %v1240_v54 = vmul.f32 0.7978846, %v1176_v33  ;;  %v1178_v23 = vadd.f32 %v3230_v3, %v3171_v35  ;;  %v3826_v3 = vld [vmem:[#allocation83_spill] sm:$0xff]  ;;  %v3830_v4 = vld [vmem:[#allocation14_spill] sm:$0xff] }
 0x1bd   :  { %v2419_v12 = vpop.eup %2418  ;;  %v1423_v27 = vmul.f32 %v1359_v42, %v911_v63  ;;  %2430 = vtanh.f32 %v1239_v28  ;;  %v1177_v37 = vadd.f32 %v3825_v30, %v3173_v51  ;;  %v915_v29 = vmul.f32 0.5, %v3816_v53  ;;  %v3829_v63 = vld [vmem:[#allocation84_spill] sm:$0xff] }
 0x1be   :  { %v1485_v17 = vmul.f32 %v1421_v1, %v3437_v56  ;;  %v1424_v61 = vmul.f32 %v1360_v57, %v912_v55  ;;  %v1362_v26 = vadd.f32 1.0, %v2419_v12  ;;  %2432 = vtanh.f32 %v1240_v54  ;;  %v3827_v56 = vld [vmem:[#allocation21_spill] sm:$0xff]  ;;  %v3831_v55 = vld [vmem:[#allocation75_spill] sm:$0xff] }
 0x1bf   :  { %v1242_v11 = vmul.f32 0.7978846, %v1178_v23  ;;  %v1487_v16 = vmul.f32 %v1423_v27, %v3442_v15  ;;  %v1241_v14 = vmul.f32 0.7978846, %v1177_v37  ;;  %v1179_v34 = vadd.f32 %v3826_v3, %v3182_v49  ;;  %v3833_v23 = vld [vmem:[#allocation23_spill] sm:$0xff] }
 0x1c0   :  { %1703 = vmatprep.mubr.f32.mxu0 %v1485_v17  ;;  %v2421_v48 = vpop.eup %2420  ;;  %v1488_v50 = vmul.f32 %v1424_v61, %v3827_v56  ;;  %v1426_v38 = vmul.f32 %v1362_v26, %v914_v40  ;;  %v916_v60 = vmul.f32 0.5, %v3132_v44  ;;  %v1180_v53 = vadd.f32 %v3829_v63, %v3828_v25 }
 0x1c1   :  { %1704 = vmatmul.mubr.f32.gmra.mrb[86].mxu0 %v1484_v41  ;;  %2434 = vtanh.f32 %v1242_v11  ;;  %v2423_v9 = vpop.eup %2422  ;;  %1848 = vmatprep.mubr.f32.mxu1 %v1487_v16  ;;  %v1361_v10 = vadd.f32 1.0, %v2421_v48  ;;  %v1243_v15 = vmul.f32 0.7978846, %v1179_v34  ;;  %v918_v47 = vmul.f32 0.5, %v3136_v22  ;;  %v3832_v41 = vld [vmem:[#allocation85_spill] sm:$0xff] }
 0x1c2   :  { %2436 = vtanh.f32 %v1241_v14  ;;  %v2425_v20 = vpop.eup %2424  ;;  %v1490_v46 = vmul.f32 %v1426_v38, %v3830_v4  ;;  %v1363_v0 = vadd.f32 1.0, %v2423_v9  ;;  %1849 = vmatmul.mubr.f32.gmra.mrb[86].mxu1 %v1486_v2  ;;  %v1182_v40 = vadd.f32 %v3832_v41, %v3831_v55  ;;  %v3834_v2 = vld [vmem:[#allocation76_spill] sm:$0xff]  ;;  %v3835_v22 = vld [vmem:[#allocation13_spill] sm:$0xff] }
 0x1c3   :  { %v2427_v44 = vpop.eup %2426  ;;  %v1425_v58 = vmul.f32 %v1361_v10, %v913_v36  ;;  %v1364_v33 = vadd.f32 1.0, %v2425_v20  ;;  %2438 = vtanh.f32 %v1243_v15  ;;  %v1244_v52 = vmul.f32 0.7978846, %v1180_v53 }
 0x1c4   :  { %v1427_v1 = vmul.f32 %v1363_v0, %v915_v29  ;;  %v1366_v42 = vadd.f32 1.0, %v2427_v44  ;;  %v917_v28 = vmul.f32 0.5, %v3820_v43  ;;  %v1246_v57 = vmul.f32 0.7978846, %v1182_v40 }
 0x1c5   :  { %v2429_v54 = vpop.eup %2428  ;;  %v1489_v12 = vmul.f32 %v1425_v58, %v3833_v23  ;;  %v1428_v17 = vmul.f32 %v1364_v33, %v916_v60  ;;  %2440 = vtanh.f32 %v1244_v52  ;;  %v1181_v27 = vadd.f32 %v3835_v22, %v3834_v2 }
 0x1c6   :  { %v1491_v30 = vmul.f32 %v1427_v1, %v3459_v62  ;;  %v1430_v37 = vmul.f32 %v1366_v42, %v918_v47  ;;  %v1365_v36 = vadd.f32 1.0, %v2429_v54  ;;  %2442 = vtanh.f32 %v1246_v57 }
 0x1c7   :  { %v2431_v61 = vpop.eup %2430  ;;  %v1492_v26 = vmul.f32 %v1428_v17, %v3467_v18  ;;  %1708 = vmatprep.mubr.f32.mxu0 %v1489_v12  ;;  %v1245_v11 = vmul.f32 0.7978846, %v1181_v27  ;;  %v1183_v43 = vadd.f32 %v3522_v32, %v3217_v5  ;;  %v919_v3 = vmul.f32 0.5, %v3148_v31 }
 0x1c8   :  { %v2433_v16 = vpop.eup %2432  ;;  %v1494_v29 = vmul.f32 %v1430_v37, %v3469_v21  ;;  %1853 = vmatprep.mubr.f32.mxu1 %v1491_v30  ;;  %v1429_v14 = vmul.f32 %v1365_v36, %v917_v28  ;;  %v1367_v34 = vadd.f32 1.0, %v2431_v61  ;;  %1709 = vmatmul.mubr.f32.gmra.mrb[88].mxu0 %v1488_v50  ;;  %v920_v62 = vmul.f32 0.5, %v3823_v59 }
 0x1c9   :  { %1854 = vmatmul.mubr.f32.gmra.mrb[88].mxu1 %v1490_v46  ;;  %v1368_v48 = vadd.f32 1.0, %v2433_v16  ;;  %2444 = vtanh.f32 %v1245_v11  ;;  %v1247_v18 = vmul.f32 0.7978846, %v1183_v43  ;;  %v922_v21 = vmul.f32 0.5, %v3171_v35  ;;  %v3836_v35 = vld [vmem:[#allocation15_spill] sm:$0xff] }
 0x1ca   :  { %v1493_v38 = vmul.f32 %v1429_v14, %v3471_v8  ;;  %v1431_v60 = vmul.f32 %v1367_v34, %v919_v3  ;;  %v921_v50 = vmul.f32 0.5, %v3173_v51  ;;  %v923_v20 = vmul.f32 0.5, %v3182_v49 }
 0x1cb   :  { %v2435_v56 = vpop.eup %2434  ;;  %v1432_v9 = vmul.f32 %v1368_v48, %v920_v62  ;;  %2446 = vtanh.f32 %v1247_v18  ;;  %v924_v51 = vmul.f32 0.5, %v3828_v25  ;;  %v925_v28 = vmul.f32 0.5, %v3834_v2 }
 0x1cc   :  { %v2437_v32 = vpop.eup %2436  ;;  %v1370_v10 = vadd.f32 1.0, %v2435_v56  ;;  %v1495_v31 = vmul.f32 %v1431_v60, %v3475_v39  ;;  %1713 = vmatprep.mubr.f32.mxu0 %v1493_v38  ;;  %v3837_v39 = vld [vmem:[#allocation24_spill] sm:$0xff] }
 0x1cd   :  { %v1369_v15 = vadd.f32 1.0, %v2437_v32  ;;  %v2439_v59 = vpop.eup %2438  ;;  %v1496_v63 = vmul.f32 %v1432_v9, %v3481_v24  ;;  %1714 = vmatmul.mubr.f32.gmra.mrb[90].mxu0 %v1492_v26  ;;  %v926_v24 = vmul.f32 0.5, %v3831_v55  ;;  %v927_v55 = vmul.f32 0.5, %v3217_v5 }
 0x1ce   :  { %v1434_v53 = vmul.f32 %v1370_v10, %v922_v21  ;;  %1858 = vmatprep.mubr.f32.mxu1 %v1495_v31  ;;  %v1371_v4 = vadd.f32 1.0, %v2439_v59 }
 0x1cf   :  { %v1433_v8 = vmul.f32 %v1369_v15, %v921_v50  ;;  %v2441_v46 = vpop.eup %2440  ;;  %1859 = vmatmul.mubr.f32.gmra.mrb[90].mxu1 %v1494_v29 }
 0x1d0   :  { %v1498_v0 = vmul.f32 %v1434_v53, %v3836_v35  ;;  %v2443_v47 = vpop.eup %2442  ;;  %v1435_v40 = vmul.f32 %v1371_v4, %v923_v20  ;;  %v1372_v44 = vadd.f32 1.0, %v2441_v46 }
 0x1d1   :  { %v1497_v41 = vmul.f32 %v1433_v8, %v3837_v39  ;;  %v1374_v58 = vadd.f32 1.0, %v2443_v47 }
 0x1d2   :  { %v1499_v33 = vmul.f32 %v1435_v40, %v3492_v7  ;;  %v1436_v52 = vmul.f32 %v1372_v44, %v924_v51 }
 0x1d3   :  { %1718 = vmatprep.mubr.f32.mxu0 %v1497_v41  ;;  %v2445_v49 = vpop.eup %2444  ;;  %v1438_v1 = vmul.f32 %v1374_v58, %v926_v24 }
 0x1d4   :  { %1719 = vmatmul.mubr.f32.gmra.mrb[92].mxu0 %v1496_v63  ;;  %v1500_v42 = vmul.f32 %v1436_v52, %v3498_v45  ;;  %1863 = vmatprep.mubr.f32.mxu1 %v1499_v33  ;;  %v1373_v57 = vadd.f32 1.0, %v2445_v49 }
 0x1d5   :  { %v2447_v54 = vpop.eup %2446  ;;  %v1502_v25 = vmul.f32 %v1438_v1, %v3501_v19  ;;  %1864 = vmatmul.mubr.f32.gmra.mrb[92].mxu1 %v1498_v0 }
 0x1d6   :  { %v1437_v23 = vmul.f32 %v1373_v57, %v925_v28  ;;  %v1375_v12 = vadd.f32 1.0, %v2447_v54 }
 0x1d8   :  { %v1501_v7 = vmul.f32 %v1437_v23, %v3503_v13  ;;  %v1439_v17 = vmul.f32 %v1375_v12, %v927_v55 }
 0x1da   :  { %v1503_v22 = vmul.f32 %v1439_v17, %v3509_v6  ;;  %1723 = vmatprep.mubr.f32.mxu0 %v1501_v7 }
 0x1db   :  { %1724 = vmatmul.mubr.f32.gmra.mrb[94].mxu0 %v1500_v42 }
 0x1dc   :  { %1868 = vmatprep.mubr.f32.mxu1 %v1503_v22 }
 0x1dd   :  { %1869 = vmatmul.mubr.f32.gmra.mrb[94].mxu1 %v1502_v25 }
 0x246   :  { %v1991_v45 = vpop.f32.mrb[64].mxu0 }
 0x247   :  { %v2071_v2 = vpop.f32.mrb[64].mxu1  ;;  %v1992_v27 = vpop.f32.mrb[65].mxu0 }
 0x248   :  { %v1993_v30 = vadd.f32 %v1992_v27, %v1991_v45  ;;  %v2072_v37 = vpop.f32.mrb[65].mxu1 }
 0x249   :  { %v2073_v19 = vadd.f32 %v2072_v37, %v2071_v2 }
 0x24a   :  { %v1994_v36 = vpop.f32.mrb[66].mxu0 }
 0x24b   :  { %v1796_v61 = vadd.f32 %v2073_v19, %v1993_v30  ;;  %v2074_v26 = vpop.f32.mrb[66].mxu1  ;;  %v1995_v5 = vpop.f32.mrb[67].mxu0 }
 0x24c   :  { %v1996_v11 = vadd.f32 %v1995_v5, %v1994_v36  ;;  %v2075_v43 = vpop.f32.mrb[67].mxu1 }
 0x24d   :  { %1925 = vst [vmem:[#allocation9] sm:$0xff] %v1796_v61  ;;  %v2076_v13 = vadd.f32 %v2075_v43, %v2074_v26 }
 0x24f   :  { %v1801_v16 = vadd.f32 %v2076_v13, %v1996_v11 }
 0x251   :  { %1926 = vst [vmem:[#allocation9 + $0x8] sm:$0xff] %v1801_v16  ;;  %v1997_v6 = vpop.f32.mrb[68].mxu0 }
 0x252   :  { %v1998_v29 = vpop.f32.mrb[69].mxu0 }
 0x253   :  { %v1999_v14 = vadd.f32 %v1998_v29, %v1997_v6 }
 0x254   :  { %v2077_v3 = vpop.f32.mrb[68].mxu1 }
 0x255   :  { %v2078_v34 = vpop.f32.mrb[69].mxu1 }
 0x256   :  { %v2079_v62 = vadd.f32 %v2078_v34, %v2077_v3 }
 0x258   :  { %v1806_v48 = vadd.f32 %v2079_v62, %v1999_v14 }
 0x25a   :  { %1927 = vst [vmem:[#allocation9 + $0x10] sm:$0xff] %v1806_v48 }
 0x25d   :  { %v2000_v18 = vpop.f32.mrb[70].mxu0 }
 0x25e   :  { %v2080_v56 = vpop.f32.mrb[70].mxu1  ;;  %v2001_v38 = vpop.f32.mrb[71].mxu0 }
 0x25f   :  { %v2002_v60 = vadd.f32 %v2001_v38, %v2000_v18  ;;  %v2081_v32 = vpop.f32.mrb[71].mxu1 }
 0x260   :  { %v2082_v9 = vadd.f32 %v2081_v32, %v2080_v56 }
 0x261   :  { %v2003_v10 = vpop.f32.mrb[72].mxu0 }
 0x262   :  { %v1811_v21 = vadd.f32 %v2082_v9, %v2002_v60  ;;  %v2004_v50 = vpop.f32.mrb[73].mxu0 }
 0x263   :  { %v2083_v31 = vpop.f32.mrb[72].mxu1  ;;  %v2005_v15 = vadd.f32 %v2004_v50, %v2003_v10 }
 0x264   :  { %1928 = vst [vmem:[#allocation9 + $0x18] sm:$0xff] %v1811_v21  ;;  %v2084_v59 = vpop.f32.mrb[73].mxu1 }
 0x265   :  { %v2085_v63 = vadd.f32 %v2084_v59, %v2083_v31 }
 0x267   :  { %v1816_v53 = vadd.f32 %v2085_v63, %v2005_v15  ;;  %v2006_v8 = vpop.f32.mrb[74].mxu0 }
 0x268   :  { %v2086_v20 = vpop.f32.mrb[74].mxu1  ;;  %v2007_v4 = vpop.f32.mrb[75].mxu0 }
 0x269   :  { %1929 = vst [vmem:[#allocation9 + $0x20] sm:$0xff] %v1816_v53  ;;  %v2008_v46 = vadd.f32 %v2007_v4, %v2006_v8  ;;  %v2087_v35 = vpop.f32.mrb[75].mxu1 }
 0x26a   :  { %v2088_v0 = vadd.f32 %v2087_v35, %v2086_v20 }
 0x26c   :  { %v1821_v47 = vadd.f32 %v2088_v0, %v2008_v46  ;;  %v2009_v39 = vpop.f32.mrb[76].mxu0 }
 0x26d   :  { %v2010_v41 = vpop.f32.mrb[77].mxu0 }
 0x26e   :  { %1930 = vst [vmem:[#allocation9 + $0x28] sm:$0xff] %v1821_v47  ;;  %v2011_v40 = vadd.f32 %v2010_v41, %v2009_v39 }
 0x26f   :  { %v2089_v51 = vpop.f32.mrb[76].mxu1 }
 0x270   :  { %v2090_v44 = vpop.f32.mrb[77].mxu1 }
 0x271   :  { %v2091_v24 = vadd.f32 %v2090_v44, %v2089_v51 }
 0x273   :  { %v1826_v58 = vadd.f32 %v2091_v24, %v2011_v40 }
 0x275   :  { %1931 = vst [vmem:[#allocation9 + $0x30] sm:$0xff] %v1826_v58 }
 0x278   :  { %v2012_v33 = vpop.f32.mrb[78].mxu0 }
 0x279   :  { %v2013_v52 = vpop.f32.mrb[79].mxu0 }
 0x27a   :  { %v2092_v49 = vpop.f32.mrb[78].mxu1  ;;  %v2014_v1 = vadd.f32 %v2013_v52, %v2012_v33 }
 0x27b   :  { %v2093_v42 = vpop.f32.mrb[79].mxu1 }
 0x27c   :  { %v2094_v28 = vadd.f32 %v2093_v42, %v2092_v49 }
 0x27e   :  { %v1831_v57 = vadd.f32 %v2094_v28, %v2014_v1  ;;  %v2015_v54 = vpop.f32.mrb[80].mxu0 }
 0x27f   :  { %v2016_v25 = vpop.f32.mrb[81].mxu0 }
 0x280   :  { %1932 = vst [vmem:[#allocation9 + $0x38] sm:$0xff] %v1831_v57  ;;  %v2095_v23 = vpop.f32.mrb[80].mxu1  ;;  %v2017_v55 = vadd.f32 %v2016_v25, %v2015_v54 }
 0x281   :  { %v2096_v12 = vpop.f32.mrb[81].mxu1 }
 0x282   :  { %v2097_v7 = vadd.f32 %v2096_v12, %v2095_v23 }
 0x283   :  { %v2018_v17 = vpop.f32.mrb[82].mxu0 }
 0x284   :  { %v1836_v22 = vadd.f32 %v2097_v7, %v2017_v55  ;;  %v2019_v45 = vpop.f32.mrb[83].mxu0 }
 0x285   :  { %v2098_v2 = vpop.f32.mrb[82].mxu1  ;;  %v2020_v27 = vadd.f32 %v2019_v45, %v2018_v17 }
 0x286   :  { %1933 = vst [vmem:[#allocation9 + $0x40] sm:$0xff] %v1836_v22  ;;  %v2099_v30 = vpop.f32.mrb[83].mxu1 }
 0x287   :  { %v2100_v37 = vadd.f32 %v2099_v30, %v2098_v2 }
 0x289   :  { %v1841_v19 = vadd.f32 %v2100_v37, %v2020_v27 }
 0x28a   :  { %v2021_v36 = vpop.f32.mrb[84].mxu0 }
 0x28b   :  { %1934 = vst [vmem:[#allocation9 + $0x48] sm:$0xff] %v1841_v19  ;;  %v2101_v61 = vpop.f32.mrb[84].mxu1  ;;  %v2022_v26 = vpop.f32.mrb[85].mxu0 }
 0x28c   :  { %v2023_v5 = vadd.f32 %v2022_v26, %v2021_v36  ;;  %v2102_v11 = vpop.f32.mrb[85].mxu1 }
 0x28d   :  { %v2103_v43 = vadd.f32 %v2102_v11, %v2101_v61 }
 0x28f   :  { %v1846_v13 = vadd.f32 %v2103_v43, %v2023_v5 }
 0x291   :  { %1935 = vst [vmem:[#allocation9 + $0x50] sm:$0xff] %v1846_v13 }
 0x294   :  { %v2024_v16 = vpop.f32.mrb[86].mxu0 }
 0x295   :  { %v2025_v6 = vpop.f32.mrb[87].mxu0  ;;  %v2104_v29 = vpop.f32.mrb[86].mxu1 }
 0x296   :  { %v2026_v14 = vadd.f32 %v2025_v6, %v2024_v16  ;;  %v2105_v3 = vpop.f32.mrb[87].mxu1 }
 0x297   :  { %v2106_v34 = vadd.f32 %v2105_v3, %v2104_v29 }
 0x299   :  { %v1851_v62 = vadd.f32 %v2106_v34, %v2026_v14 }
 0x29b   :  { %1936 = vst [vmem:[#allocation9 + $0x58] sm:$0xff] %v1851_v62  ;;  %v2027_v48 = vpop.f32.mrb[88].mxu0 }
 0x29c   :  { %v2107_v18 = vpop.f32.mrb[88].mxu1  ;;  %v2028_v56 = vpop.f32.mrb[89].mxu0 }
 0x29d   :  { %v2029_v38 = vadd.f32 %v2028_v56, %v2027_v48  ;;  %v2108_v60 = vpop.f32.mrb[89].mxu1 }
 0x29e   :  { %v2109_v32 = vadd.f32 %v2108_v60, %v2107_v18 }
 0x2a0   :  { %v1856_v9 = vadd.f32 %v2109_v32, %v2029_v38  ;;  %v2030_v21 = vpop.f32.mrb[90].mxu0 }
 0x2a1   :  { %v2031_v10 = vpop.f32.mrb[91].mxu0 }
 0x2a2   :  { %1937 = vst [vmem:[#allocation9 + $0x60] sm:$0xff] %v1856_v9  ;;  %v2110_v31 = vpop.f32.mrb[90].mxu1  ;;  %v2032_v50 = vadd.f32 %v2031_v10, %v2030_v21 }
 0x2a3   :  { %v2111_v15 = vpop.f32.mrb[91].mxu1 }
 0x2a4   :  { %v2112_v59 = vadd.f32 %v2111_v15, %v2110_v31 }
 0x2a6   :  { %v1861_v63 = vadd.f32 %v2112_v59, %v2032_v50 }
 0x2a7   :  { %v2033_v53 = vpop.f32.mrb[92].mxu0 }
 0x2a8   :  { %v2034_v8 = vpop.f32.mrb[93].mxu0  ;;  %1938 = vst [vmem:[#allocation9 + $0x68] sm:$0xff] %v1861_v63  ;;  %v2113_v20 = vpop.f32.mrb[92].mxu1 }
 0x2a9   :  { %v2035_v4 = vadd.f32 %v2034_v8, %v2033_v53  ;;  %v2114_v46 = vpop.f32.mrb[93].mxu1 }
 0x2aa   :  { %v2115_v35 = vadd.f32 %v2114_v46, %v2113_v20 }
 0x2ac   :  { %v1866_v0 = vadd.f32 %v2115_v35, %v2035_v4 }
 0x2ae   :  { %1939 = vst [vmem:[#allocation9 + $0x70] sm:$0xff] %v1866_v0  ;;  %v2036_v47 = vpop.f32.mrb[94].mxu0 }
 0x2af   :  { %v2037_v39 = vpop.f32.mrb[95].mxu0 }
 0x2b0   :  { %v2116_v41 = vpop.f32.mrb[94].mxu1  ;;  %v2038_v40 = vadd.f32 %v2037_v39, %v2036_v47 }
 0x2b1   :  { %v2117_v51 = vpop.f32.mrb[95].mxu1 }
 0x2b2   :  { %v2118_v44 = vadd.f32 %v2117_v51, %v2116_v41 }
 0x2b4   :  { %v1871_v24 = vadd.f32 %v2118_v44, %v2038_v40 }
 0x2b6   :  { %1940 = vst [vmem:[#allocation9 + $0x78] sm:$0xff] %v1871_v24 }
 0x2b7   :  { %2525 = shalt.err (!%p2522_p0)
}
 0x2b8   :  { %s2526_s27 = scalar_lea.hbm %s3613_s3, 2048 }
 0x2b9   :  { %p2527_p1 = scmp.ne.s32.totalorder %s3613_s3, %s2526_s27  ;;  %p2530_p2 = scmp.lt.u32.totalorder %s2526_s27, %s3613_s3 }
 0x2bb   :  { %p2532_p3 = pnand %p2530_p2, %p2527_p1 }
 0x2bd   :  { %2535 = shalt.err (!%p2532_p3)
}
 0x2be   :  { %1952 = dma.vmem_to_hbm [thread:$0]  %s1947_s23, 2048, %s3613_s3, [#allocation5], %s2546_s1, %s2546_s1, %s2547_s9  }
 0x2bf   :  { %2540 = dma.done.wait [#allocation5], 2048  }
 0x2c0   :  { %2541 = vsyncadd [#allocation5], 4294965248 }
 0x2c1   :  { %1956 = vsyncpa [#allocation4], 1 }
 0x2c2   :  { %1957 = vsyncpa [#allocation7], 1 }
 0x2c3   :  { %1958 = vsyncpa [#allocation5], 1 }

</bundles_post_ra>
